<compile_context>
chip_gen: v7x
topology: tpu7x:2x2x1
jax: 0.10.0
libtpu: 0.0.40
codegen_flags: <defaults>
</compile_context>

<pallas_src>
import math
import numpy as np
import jax
import jax.numpy as jnp
from jax.experimental import pallas as pl
from jax.experimental.pallas import tpu as pltpu


# ----------------------------- helpers ------------------------------------- #
def _elu(x):
    # ELU(alpha=1); exp only sees the clamped branch -> no inf in discarded lane.
    return jnp.where(x > 0, x, jnp.exp(jnp.minimum(x, 0.0)) - 1.0)


# --------------------------- fused kernel ----------------------------------- #
def _make_fused_kernel(cfg, n_units, has_post, out_w):
    pc_begin = cfg["pc_begin"]
    pc_end = cfg["pc_end"]
    pc_num = cfg["pc_num"]
    A = cfg["actions_num"]
    log2pi = math.log(2.0 * math.pi)

    def kernel(*refs):
        out_ref = refs[-1]
        vals = [r[...] for r in refs[:-1]]
        it = iter(vals)

        obs = next(it)             # (TB, input_shape)
        prev_actions = next(it)    # (TB, A)
        w1 = next(it); b1 = next(it)
        w2 = next(it); b2 = next(it)
        w3 = next(it); b3 = next(it)

        tb = obs.shape[0]

        # ---- point-net, batched over all points (3 MXU matmuls total) ----
        pts = [obs[:, pc_begin + 3 * p: pc_begin + 3 * (p + 1)]   # (TB, 3) each
               for p in range(pc_num)]
        pc_flat = jnp.concatenate(pts, axis=0)                    # (pc_num*TB, 3)
        h = _elu(jnp.dot(pc_flat, w1, preferred_element_type=jnp.float32) + b1)
        h = _elu(jnp.dot(h, w2, preferred_element_type=jnp.float32) + b2)
        h = jnp.dot(h, w3, preferred_element_type=jnp.float32) + b3

        # MaxPool2d((pc_num, 1)): running max over per-point row slices.
        pc_rep = h[0:tb, :]
        for p in range(1, pc_num):                                # static unroll
            pc_rep = jnp.maximum(pc_rep, h[p * tb:(p + 1) * tb, :])

        # ---- actor MLP (first layer uses split weights -> no concat) ----
        wa_pre = next(it); wa_pc = next(it); ba1 = next(it)
        x = _elu(jnp.dot(obs[:, :pc_begin], wa_pre, preferred_element_type=jnp.float32)
                 + jnp.dot(pc_rep, wa_pc, preferred_element_type=jnp.float32) + ba1)
        for _ in range(n_units - 1):
            w = next(it); b = next(it)
            x = _elu(jnp.dot(x, w, preferred_element_type=jnp.float32) + b)

        # ---- value MLP (first layer split: pre-obs / pc_rep / post-obs) ----
        wv_pre = next(it); wv_pc = next(it)
        wv_post = next(it) if has_post else None
        bv1 = next(it)
        v = (jnp.dot(obs[:, :pc_begin], wv_pre, preferred_element_type=jnp.float32)
             + jnp.dot(pc_rep, wv_pc, preferred_element_type=jnp.float32) + bv1)
        if has_post:
            v = v + jnp.dot(obs[:, pc_end:], wv_post,
                            preferred_element_type=jnp.float32)
        v = _elu(v)
        for _ in range(n_units - 1):
            w = next(it); b = next(it)
            v = _elu(jnp.dot(v, w, preferred_element_type=jnp.float32) + b)

        # ---- heads ----
        w_vf = next(it); b_vf = next(it)
        w_mu = next(it); b_mu = next(it)
        logstd = next(it)                                                  # (1, A)

        value = jnp.dot(v, w_vf, preferred_element_type=jnp.float32) + b_vf  # (TB, 1)
        mu = jnp.dot(x, w_mu, preferred_element_type=jnp.float32) + b_mu     # (TB, A)

        sigma_row = jnp.exp(logstd)                                           # (1, A)
        ent_row = jnp.sum(0.5 + 0.5 * log2pi + logstd, axis=1, keepdims=True) # (1, 1)
        logstd_sum = jnp.sum(logstd, axis=1, keepdims=True)                   # (1, 1)
        diff = prev_actions - mu
        inv_two_var = 0.5 * jnp.exp(-2.0 * logstd)                            # (1, A)
        nlp = (jnp.sum(diff * diff * inv_two_var, axis=1, keepdims=True)
               + logstd_sum + 0.5 * A * log2pi)                               # (TB, 1)

        # ---- pack everything into one lane-dense slab (single dense DMA) ----
        out_ref[...] = jnp.zeros_like(out_ref)
        out_ref[:, 0:A] = mu
        out_ref[:, A:2 * A] = jnp.broadcast_to(sigma_row, (tb, A))
        out_ref[:, 2 * A:2 * A + 1] = value
        out_ref[:, 2 * A + 1:2 * A + 2] = jnp.broadcast_to(ent_row, (tb, 1))
        out_ref[:, 2 * A + 2:2 * A + 3] = nlp

    return kernel


# ------------------------------ parameters ---------------------------------- #
def _linear(key, fan_in, fan_out):
    k = 1.0 / math.sqrt(fan_in)
    w = jax.random.uniform(key, (fan_in, fan_out), jnp.float32, -k, k)
    b = jnp.zeros((1, fan_out), jnp.float32)   # module zero-inits Linear biases
    return w, b


def init_params(key, cfg):
    D = cfg["pc_out_dim"]
    keys = iter(jax.random.split(key, 16))
    params = {}
    params["point_net"] = [_linear(next(keys), 3, D),
                           _linear(next(keys), D, D),
                           _linear(next(keys), D, D)]
    actor, in_size = [], cfg["pc_begin"] + D
    for u in cfg["actor_units"]:
        actor.append(_linear(next(keys), in_size, u)); in_size = u
    params["actor_mlp"] = actor
    value, in_size = [], cfg["input_shape"]
    for u in cfg["actor_units"]:
        value.append(_linear(next(keys), in_size, u)); in_size = u
    params["value_mlp"] = value
    out_size = cfg["actor_units"][-1]
    params["value_final"] = _linear(next(keys), out_size, 1)
    params["mu"] = _linear(next(keys), out_size, cfg["actions_num"])
    params["sigma"] = jnp.zeros((1, cfg["actions_num"]), jnp.float32)
    return params


# ------------------------------- forward ------------------------------------ #
def forward(params, obs, prev_actions, cfg, *, block_b=512):
    obs = jnp.asarray(obs, jnp.float32)
    prev_actions = jnp.asarray(prev_actions, jnp.float32)
    B, input_shape = obs.shape
    A = cfg["actions_num"]
    D = cfg["pc_out_dim"]
    pc_begin, pc_end = cfg["pc_begin"], cfg["pc_end"]
    units = list(cfg["actor_units"])
    n_units = len(units)
    has_post = (input_shape - pc_end) > 0
    out_w = 128 * pl.cdiv(2 * A + 3, 128)       # lane-dense packed output width

    # batch tiling: whole batch in one tile when small, otherwise tile + pad.
    if B <= block_b:
        tb, b_pad = B, B
    else:
        tb = block_b                            # multiple of 8; VMEM-safe on v7x
        b_pad = tb * pl.cdiv(B, tb)
    if b_pad != B:
        obs = jnp.pad(obs, ((0, b_pad - B), (0, 0)))
        prev_actions = jnp.pad(prev_actions, ((0, b_pad - B), (0, 0)))

    (w1, b1), (w2, b2), (w3, b3) = params["point_net"]
    actor = params["actor_mlp"]
    value = params["value_mlp"]
    wa1, ba1 = actor[0]
    wv1, bv1 = value[0]

    inputs = [obs, prev_actions, w1, b1, w2, b2, w3, b3,
              wa1[:pc_begin], wa1[pc_begin:], ba1]
    for w, b in actor[1:]:
        inputs += [w, b]
    inputs += [wv1[:pc_begin], wv1[pc_begin:pc_begin + D]]
    if has_post:
        inputs += [wv1[pc_begin + D:]]
    inputs += [bv1]
    for w, b in value[1:]:
        inputs += [w, b]
    inputs += [params["value_final"][0], params["value_final"][1],
               params["mu"][0], params["mu"][1], params["sigma"]]

    in_specs = [pl.BlockSpec((tb, input_shape), lambda i: (i, 0)),
                pl.BlockSpec((tb, A), lambda i: (i, 0))]
    for arr in inputs[2:]:                      # weights stay resident
        in_specs.append(pl.BlockSpec(arr.shape, lambda i: (0, 0)))
    out_spec = pl.BlockSpec((tb, out_w), lambda i: (i, 0))

    # rough cost hint so XLA can overlap this tiny call with surrounding ops
    flops_row = 2 * cfg["pc_num"] * (3 * D + 2 * D * D)
    for dims in ([pc_begin + D] + units, [input_shape] + units):
        for fi, fo in zip(dims[:-1], dims[1:]):
            flops_row += 2 * fi * fo
    flops_row += 2 * units[-1] * (1 + A)
    bytes_accessed = 4 * (obs.size + prev_actions.size + b_pad * out_w
                          + sum(int(np.prod(a.shape)) for a in inputs[2:]))
    cost = pl.CostEstimate(
        flops=int(flops_row) * int(b_pad),
        transcendentals=int(b_pad) * (2 * cfg["pc_num"] * D + 2 * sum(units) + 2 * A),
        bytes_accessed=int(bytes_accessed))

    slab = pl.pallas_call(
        _make_fused_kernel(cfg, n_units, has_post, out_w),
        out_shape=jax.ShapeDtypeStruct((b_pad, out_w), jnp.float32),
        grid=(b_pad // tb,),
        in_specs=in_specs,
        out_specs=out_spec,
        compiler_params=pltpu.CompilerParams(
            dimension_semantics=("parallel",),          # megacore sharding (v7x)
            vmem_limit_bytes=32 * 1024 * 1024),         # safe on v5e/v6e/v7x
        cost_estimate=cost,
    )(*inputs)

    slab = slab[:B]
    mu = slab[:, :A]
    sigma = slab[:, A:2 * A]
    val = slab[:, 2 * A:2 * A + 1]
    entropy = slab[:, 2 * A + 1]
    neglogp = slab[:, 2 * A + 2]
    return {"prev_neglogp": neglogp, "values": val, "entropy": entropy,
            "mus": mu, "sigmas": sigma}


# -------------------------- pure numpy reference ----------------------------- #
def _np_elu(x):
    return np.where(x > 0, x, np.exp(np.minimum(x, 0.0)) - 1.0)


def ref_forward(params, obs, prev_actions, cfg):
    p = jax.tree_util.tree_map(np.asarray, params)
    obs = np.asarray(obs); pa = np.asarray(prev_actions)
    B = obs.shape[0]
    pc_begin, pc_end, pc_num = cfg["pc_begin"], cfg["pc_end"], cfg["pc_num"]
    pc = obs[:, pc_begin:pc_end].reshape(B, pc_num, 3)
    (w1, b1), (w2, b2), (w3, b3) = p["point_net"]
    h = _np_elu(pc @ w1 + b1)
    h = _np_elu(h @ w2 + b2)
    h = h @ w3 + b3
    pc_rep = h.max(axis=1)
    obs_new = np.concatenate([obs[:, :pc_begin], pc_rep, obs[:, pc_end:]], axis=1)
    x = obs_new[:, :pc_begin + cfg["pc_out_dim"]]
    for w, b in p["actor_mlp"]:
        x = _np_elu(x @ w + b)
    v = obs_new
    for w, b in p["value_mlp"]:
        v = _np_elu(v @ w + b)
    value = v @ p["value_final"][0] + p["value_final"][1]
    mu = x @ p["mu"][0] + p["mu"][1]
    logstd = mu * 0.0 + p["sigma"]
    sigma = np.exp(logstd)
    log2pi = math.log(2.0 * math.pi)
    entropy = (0.5 + 0.5 * log2pi + logstd).sum(-1)
    logp = -((pa - mu) ** 2) / (2.0 * sigma ** 2) - logstd - 0.5 * log2pi
    neglogp = -logp.sum(1)
    return {"prev_neglogp": neglogp, "values": value, "entropy": entropy,
            "mus": mu, "sigmas": sigma}


# --------------------------------- main -------------------------------------- #
if __name__ == "__main__":
    cfg = dict(
        actions_num=6,
        input_shape=40,          # obs width
        actor_units=[32, 32],
        pc_out_dim=24,           # equals 3 * pc_num so the value MLP width matches
        pc_begin=5,
        pc_end=29,               # pc_end - pc_begin = pc_num * 3
        pc_num=8,
    )
    B = 2
    key = jax.random.PRNGKey(0)
    kp, ko, ka = jax.random.split(key, 3)
    params = init_params(kp, cfg)
    obs = jax.random.normal(ko, (B, cfg["input_shape"]), jnp.float32)
    prev_actions = jax.random.normal(ka, (B, cfg["actions_num"]), jnp.float32)

    out = forward(params, obs, prev_actions, cfg)
    out = jax.tree_util.tree_map(jax.block_until_ready, out)

    ref = ref_forward(params, obs, prev_actions, cfg)
    for k in ("mus", "sigmas", "values", "entropy", "prev_neglogp"):
        got = np.asarray(out[k]).reshape(-1)
        want = np.asarray(ref[k]).reshape(-1)
        assert np.max(np.abs(got - want)) < 5e-3, f"mismatch in {k}"

    print("KERNEL_OK")
</pallas_src>

<mosaic_0001>
module attributes {stable_mosaic.version = 11 : i64} {
  func.func @kernel(%arg0: i32, %arg1: memref<2x40xf32, #tpu.memory_space<vmem>>, %arg2: memref<2x6xf32, #tpu.memory_space<vmem>>, %arg3: memref<3x24xf32, #tpu.memory_space<vmem>>, %arg4: memref<1x24xf32, #tpu.memory_space<vmem>>, %arg5: memref<24x24xf32, #tpu.memory_space<vmem>>, %arg6: memref<1x24xf32, #tpu.memory_space<vmem>>, %arg7: memref<24x24xf32, #tpu.memory_space<vmem>>, %arg8: memref<1x24xf32, #tpu.memory_space<vmem>>, %arg9: memref<5x32xf32, #tpu.memory_space<vmem>>, %arg10: memref<24x32xf32, #tpu.memory_space<vmem>>, %arg11: memref<1x32xf32, #tpu.memory_space<vmem>>, %arg12: memref<32x32xf32, #tpu.memory_space<vmem>>, %arg13: memref<1x32xf32, #tpu.memory_space<vmem>>, %arg14: memref<5x32xf32, #tpu.memory_space<vmem>>, %arg15: memref<24x32xf32, #tpu.memory_space<vmem>>, %arg16: memref<11x32xf32, #tpu.memory_space<vmem>>, %arg17: memref<1x32xf32, #tpu.memory_space<vmem>>, %arg18: memref<32x32xf32, #tpu.memory_space<vmem>>, %arg19: memref<1x32xf32, #tpu.memory_space<vmem>>, %arg20: memref<32x1xf32, #tpu.memory_space<vmem>>, %arg21: memref<1x1xf32, #tpu.memory_space<vmem>>, %arg22: memref<32x6xf32, #tpu.memory_space<vmem>>, %arg23: memref<1x6xf32, #tpu.memory_space<vmem>>, %arg24: memref<1x6xf32, #tpu.memory_space<vmem>>, %arg25: memref<2x128xf32, #tpu.memory_space<vmem>>) attributes {dimension_semantics = [#tpu.dimension_semantics<parallel>], iteration_bounds = array<i64: 1>, scalar_prefetch = 0 : i64, scratch_operands = 0 : i64, tpu.core_type = #tpu.core_type<tc>, window_params = [{transform_indices = @transform_0, window_bounds = array<i64: 2, 40>}, {transform_indices = @transform_1, window_bounds = array<i64: 2, 6>}, {pipeline_mode = #tpu.pipeline_mode<synchronous>, transform_indices = @transform_2, window_bounds = array<i64: 3, 24>}, {pipeline_mode = #tpu.pipeline_mode<synchronous>, transform_indices = @transform_3, window_bounds = array<i64: 1, 24>}, {pipeline_mode = #tpu.pipeline_mode<synchronous>, transform_indices = @transform_4, window_bounds = array<i64: 24, 24>}, {pipeline_mode = #tpu.pipeline_mode<synchronous>, transform_indices = @transform_5, window_bounds = array<i64: 1, 24>}, {pipeline_mode = #tpu.pipeline_mode<synchronous>, transform_indices = @transform_6, window_bounds = array<i64: 24, 24>}, {pipeline_mode = #tpu.pipeline_mode<synchronous>, transform_indices = @transform_7, window_bounds = array<i64: 1, 24>}, {pipeline_mode = #tpu.pipeline_mode<synchronous>, transform_indices = @transform_8, window_bounds = array<i64: 5, 32>}, {pipeline_mode = #tpu.pipeline_mode<synchronous>, transform_indices = @transform_9, window_bounds = array<i64: 24, 32>}, {pipeline_mode = #tpu.pipeline_mode<synchronous>, transform_indices = @transform_10, window_bounds = array<i64: 1, 32>}, {pipeline_mode = #tpu.pipeline_mode<synchronous>, transform_indices = @transform_11, window_bounds = array<i64: 32, 32>}, {pipeline_mode = #tpu.pipeline_mode<synchronous>, transform_indices = @transform_12, window_bounds = array<i64: 1, 32>}, {pipeline_mode = #tpu.pipeline_mode<synchronous>, transform_indices = @transform_13, window_bounds = array<i64: 5, 32>}, {pipeline_mode = #tpu.pipeline_mode<synchronous>, transform_indices = @transform_14, window_bounds = array<i64: 24, 32>}, {pipeline_mode = #tpu.pipeline_mode<synchronous>, transform_indices = @transform_15, window_bounds = array<i64: 11, 32>}, {pipeline_mode = #tpu.pipeline_mode<synchronous>, transform_indices = @transform_16, window_bounds = array<i64: 1, 32>}, {pipeline_mode = #tpu.pipeline_mode<synchronous>, transform_indices = @transform_17, window_bounds = array<i64: 32, 32>}, {pipeline_mode = #tpu.pipeline_mode<synchronous>, transform_indices = @transform_18, window_bounds = array<i64: 1, 32>}, {pipeline_mode = #tpu.pipeline_mode<synchronous>, transform_indices = @transform_19, window_bounds = array<i64: 32, 1>}, {pipeline_mode = #tpu.pipeline_mode<synchronous>, transform_indices = @transform_20, window_bounds = array<i64: 1, 1>}, {pipeline_mode = #tpu.pipeline_mode<synchronous>, transform_indices = @transform_21, window_bounds = array<i64: 32, 6>}, {pipeline_mode = #tpu.pipeline_mode<synchronous>, transform_indices = @transform_22, window_bounds = array<i64: 1, 6>}, {pipeline_mode = #tpu.pipeline_mode<synchronous>, transform_indices = @transform_23, window_bounds = array<i64: 1, 6>}, {transform_indices = @transform_24, window_bounds = array<i64: 2, 128>}]} {
    %c0 = arith.constant 0 : index
    %c0_0 = arith.constant 0 : index
    %0 = vector.load %arg1[%c0, %c0_0] : memref<2x40xf32, #tpu.memory_space<vmem>>, vector<2x40xf32>
    %c0_1 = arith.constant 0 : index
    %c0_2 = arith.constant 0 : index
    %1 = vector.load %arg2[%c0_1, %c0_2] : memref<2x6xf32, #tpu.memory_space<vmem>>, vector<2x6xf32>
    %c0_3 = arith.constant 0 : index
    %c0_4 = arith.constant 0 : index
    %2 = vector.load %arg3[%c0_3, %c0_4] : memref<3x24xf32, #tpu.memory_space<vmem>>, vector<3x24xf32>
    %c0_5 = arith.constant 0 : index
    %c0_6 = arith.constant 0 : index
    %3 = vector.load %arg4[%c0_5, %c0_6] : memref<1x24xf32, #tpu.memory_space<vmem>>, vector<1x24xf32>
    %c0_7 = arith.constant 0 : index
    %c0_8 = arith.constant 0 : index
    %4 = vector.load %arg5[%c0_7, %c0_8] : memref<24x24xf32, #tpu.memory_space<vmem>>, vector<24x24xf32>
    %c0_9 = arith.constant 0 : index
    %c0_10 = arith.constant 0 : index
    %5 = vector.load %arg6[%c0_9, %c0_10] : memref<1x24xf32, #tpu.memory_space<vmem>>, vector<1x24xf32>
    %c0_11 = arith.constant 0 : index
    %c0_12 = arith.constant 0 : index
    %6 = vector.load %arg7[%c0_11, %c0_12] : memref<24x24xf32, #tpu.memory_space<vmem>>, vector<24x24xf32>
    %c0_13 = arith.constant 0 : index
    %c0_14 = arith.constant 0 : index
    %7 = vector.load %arg8[%c0_13, %c0_14] : memref<1x24xf32, #tpu.memory_space<vmem>>, vector<1x24xf32>
    %c0_15 = arith.constant 0 : index
    %c0_16 = arith.constant 0 : index
    %8 = vector.load %arg9[%c0_15, %c0_16] : memref<5x32xf32, #tpu.memory_space<vmem>>, vector<5x32xf32>
    %c0_17 = arith.constant 0 : index
    %c0_18 = arith.constant 0 : index
    %9 = vector.load %arg10[%c0_17, %c0_18] : memref<24x32xf32, #tpu.memory_space<vmem>>, vector<24x32xf32>
    %c0_19 = arith.constant 0 : index
    %c0_20 = arith.constant 0 : index
    %10 = vector.load %arg11[%c0_19, %c0_20] : memref<1x32xf32, #tpu.memory_space<vmem>>, vector<1x32xf32>
    %c0_21 = arith.constant 0 : index
    %c0_22 = arith.constant 0 : index
    %11 = vector.load %arg12[%c0_21, %c0_22] : memref<32x32xf32, #tpu.memory_space<vmem>>, vector<32x32xf32>
    %c0_23 = arith.constant 0 : index
    %c0_24 = arith.constant 0 : index
    %12 = vector.load %arg13[%c0_23, %c0_24] : memref<1x32xf32, #tpu.memory_space<vmem>>, vector<1x32xf32>
    %c0_25 = arith.constant 0 : index
    %c0_26 = arith.constant 0 : index
    %13 = vector.load %arg14[%c0_25, %c0_26] : memref<5x32xf32, #tpu.memory_space<vmem>>, vector<5x32xf32>
    %c0_27 = arith.constant 0 : index
    %c0_28 = arith.constant 0 : index
    %14 = vector.load %arg15[%c0_27, %c0_28] : memref<24x32xf32, #tpu.memory_space<vmem>>, vector<24x32xf32>
    %c0_29 = arith.constant 0 : index
    %c0_30 = arith.constant 0 : index
    %15 = vector.load %arg16[%c0_29, %c0_30] : memref<11x32xf32, #tpu.memory_space<vmem>>, vector<11x32xf32>
    %c0_31 = arith.constant 0 : index
    %c0_32 = arith.constant 0 : index
    %16 = vector.load %arg17[%c0_31, %c0_32] : memref<1x32xf32, #tpu.memory_space<vmem>>, vector<1x32xf32>
    %c0_33 = arith.constant 0 : index
    %c0_34 = arith.constant 0 : index
    %17 = vector.load %arg18[%c0_33, %c0_34] : memref<32x32xf32, #tpu.memory_space<vmem>>, vector<32x32xf32>
    %c0_35 = arith.constant 0 : index
    %c0_36 = arith.constant 0 : index
    %18 = vector.load %arg19[%c0_35, %c0_36] : memref<1x32xf32, #tpu.memory_space<vmem>>, vector<1x32xf32>
    %c0_37 = arith.constant 0 : index
    %c0_38 = arith.constant 0 : index
    %19 = vector.load %arg20[%c0_37, %c0_38] : memref<32x1xf32, #tpu.memory_space<vmem>>, vector<32x1xf32>
    %c0_39 = arith.constant 0 : index
    %c0_40 = arith.constant 0 : index
    %20 = vector.load %arg21[%c0_39, %c0_40] : memref<1x1xf32, #tpu.memory_space<vmem>>, vector<1x1xf32>
    %c0_41 = arith.constant 0 : index
    %c0_42 = arith.constant 0 : index
    %21 = vector.load %arg22[%c0_41, %c0_42] : memref<32x6xf32, #tpu.memory_space<vmem>>, vector<32x6xf32>
    %c0_43 = arith.constant 0 : index
    %c0_44 = arith.constant 0 : index
    %22 = vector.load %arg23[%c0_43, %c0_44] : memref<1x6xf32, #tpu.memory_space<vmem>>, vector<1x6xf32>
    %c0_45 = arith.constant 0 : index
    %c0_46 = arith.constant 0 : index
    %23 = vector.load %arg24[%c0_45, %c0_46] : memref<1x6xf32, #tpu.memory_space<vmem>>, vector<1x6xf32>
    %24 = vector.extract_strided_slice %0 {offsets = [0, 5], sizes = [2, 3], strides = [1, 1]} : vector<2x40xf32> to vector<2x3xf32>
    %25 = vector.extract_strided_slice %0 {offsets = [0, 8], sizes = [2, 3], strides = [1, 1]} : vector<2x40xf32> to vector<2x3xf32>
    %26 = vector.extract_strided_slice %0 {offsets = [0, 11], sizes = [2, 3], strides = [1, 1]} : vector<2x40xf32> to vector<2x3xf32>
    %27 = vector.extract_strided_slice %0 {offsets = [0, 14], sizes = [2, 3], strides = [1, 1]} : vector<2x40xf32> to vector<2x3xf32>
    %28 = vector.extract_strided_slice %0 {offsets = [0, 17], sizes = [2, 3], strides = [1, 1]} : vector<2x40xf32> to vector<2x3xf32>
    %29 = vector.extract_strided_slice %0 {offsets = [0, 20], sizes = [2, 3], strides = [1, 1]} : vector<2x40xf32> to vector<2x3xf32>
    %30 = vector.extract_strided_slice %0 {offsets = [0, 23], sizes = [2, 3], strides = [1, 1]} : vector<2x40xf32> to vector<2x3xf32>
    %31 = vector.extract_strided_slice %0 {offsets = [0, 26], sizes = [2, 3], strides = [1, 1]} : vector<2x40xf32> to vector<2x3xf32>
    %32 = tpu.concatenate %24, %25, %26, %27, %28, %29, %30, %31 in 0 : vector<2x3xf32>, vector<2x3xf32>, vector<2x3xf32>, vector<2x3xf32>, vector<2x3xf32>, vector<2x3xf32>, vector<2x3xf32>, vector<2x3xf32> -> vector<16x3xf32>
    %cst = arith.constant dense<0.000000e+00> : vector<16x24xf32>
    %33 = tpu.matmul %32, %2, %cst {dimension_numbers = #tpu.dot_dimension_numbers<[1], [0], [0], [1], [0, 0, 1, 1], [], []>} : vector<16x3xf32>, vector<3x24xf32>, vector<16x24xf32> -> vector<16x24xf32>
    %34 = vector.broadcast %3 : vector<1x24xf32> to vector<16x24xf32>
    %35 = arith.addf %33, %34 : vector<16x24xf32>
    %cst_47 = arith.constant 0.000000e+00 : f32
    %36 = vector.broadcast %cst_47 : f32 to vector<16x24xf32>
    %37 = arith.cmpf ogt, %35, %36 : vector<16x24xf32>
    %cst_48 = arith.constant 0.000000e+00 : f32
    %38 = vector.broadcast %cst_48 : f32 to vector<16x24xf32>
    %39 = arith.minimumf %35, %38 : vector<16x24xf32>
    %40 = math.exp %39 : vector<16x24xf32>
    %cst_49 = arith.constant 1.000000e+00 : f32
    %41 = vector.broadcast %cst_49 : f32 to vector<16x24xf32>
    %42 = arith.subf %40, %41 : vector<16x24xf32>
    %43 = arith.select %37, %35, %42 : vector<16x24xi1>, vector<16x24xf32>
    %cst_50 = arith.constant dense<0.000000e+00> : vector<16x24xf32>
    %44 = tpu.matmul %43, %4, %cst_50 {dimension_numbers = #tpu.dot_dimension_numbers<[1], [0], [0], [1], [0, 0, 1, 1], [], []>} : vector<16x24xf32>, vector<24x24xf32>, vector<16x24xf32> -> vector<16x24xf32>
    %45 = vector.broadcast %5 : vector<1x24xf32> to vector<16x24xf32>
    %46 = arith.addf %44, %45 : vector<16x24xf32>
    %cst_51 = arith.constant 0.000000e+00 : f32
    %47 = vector.broadcast %cst_51 : f32 to vector<16x24xf32>
    %48 = arith.cmpf ogt, %46, %47 : vector<16x24xf32>
    %cst_52 = arith.constant 0.000000e+00 : f32
    %49 = vector.broadcast %cst_52 : f32 to vector<16x24xf32>
    %50 = arith.minimumf %46, %49 : vector<16x24xf32>
    %51 = math.exp %50 : vector<16x24xf32>
    %cst_53 = arith.constant 1.000000e+00 : f32
    %52 = vector.broadcast %cst_53 : f32 to vector<16x24xf32>
    %53 = arith.subf %51, %52 : vector<16x24xf32>
    %54 = arith.select %48, %46, %53 : vector<16x24xi1>, vector<16x24xf32>
    %cst_54 = arith.constant dense<0.000000e+00> : vector<16x24xf32>
    %55 = tpu.matmul %54, %6, %cst_54 {dimension_numbers = #tpu.dot_dimension_numbers<[1], [0], [0], [1], [0, 0, 1, 1], [], []>} : vector<16x24xf32>, vector<24x24xf32>, vector<16x24xf32> -> vector<16x24xf32>
    %56 = vector.broadcast %7 : vector<1x24xf32> to vector<16x24xf32>
    %57 = arith.addf %55, %56 : vector<16x24xf32>
    %58 = vector.extract_strided_slice %57 {offsets = [0, 0], sizes = [2, 24], strides = [1, 1]} : vector<16x24xf32> to vector<2x24xf32>
    %59 = vector.extract_strided_slice %57 {offsets = [2, 0], sizes = [2, 24], strides = [1, 1]} : vector<16x24xf32> to vector<2x24xf32>
    %60 = arith.maximumf %58, %59 : vector<2x24xf32>
    %61 = vector.extract_strided_slice %57 {offsets = [4, 0], sizes = [2, 24], strides = [1, 1]} : vector<16x24xf32> to vector<2x24xf32>
    %62 = arith.maximumf %60, %61 : vector<2x24xf32>
    %63 = vector.extract_strided_slice %57 {offsets = [6, 0], sizes = [2, 24], strides = [1, 1]} : vector<16x24xf32> to vector<2x24xf32>
    %64 = arith.maximumf %62, %63 : vector<2x24xf32>
    %65 = vector.extract_strided_slice %57 {offsets = [8, 0], sizes = [2, 24], strides = [1, 1]} : vector<16x24xf32> to vector<2x24xf32>
    %66 = arith.maximumf %64, %65 : vector<2x24xf32>
    %67 = vector.extract_strided_slice %57 {offsets = [10, 0], sizes = [2, 24], strides = [1, 1]} : vector<16x24xf32> to vector<2x24xf32>
    %68 = arith.maximumf %66, %67 : vector<2x24xf32>
    %69 = vector.extract_strided_slice %57 {offsets = [12, 0], sizes = [2, 24], strides = [1, 1]} : vector<16x24xf32> to vector<2x24xf32>
    %70 = arith.maximumf %68, %69 : vector<2x24xf32>
    %71 = vector.extract_strided_slice %57 {offsets = [14, 0], sizes = [2, 24], strides = [1, 1]} : vector<16x24xf32> to vector<2x24xf32>
    %72 = arith.maximumf %70, %71 : vector<2x24xf32>
    %73 = vector.extract_strided_slice %0 {offsets = [0, 0], sizes = [2, 5], strides = [1, 1]} : vector<2x40xf32> to vector<2x5xf32>
    %cst_55 = arith.constant dense<0.000000e+00> : vector<2x32xf32>
    %74 = tpu.matmul %73, %8, %cst_55 {dimension_numbers = #tpu.dot_dimension_numbers<[1], [0], [0], [1], [0, 0, 1, 1], [], []>} : vector<2x5xf32>, vector<5x32xf32>, vector<2x32xf32> -> vector<2x32xf32>
    %cst_56 = arith.constant dense<0.000000e+00> : vector<2x32xf32>
    %75 = tpu.matmul %72, %9, %cst_56 {dimension_numbers = #tpu.dot_dimension_numbers<[1], [0], [0], [1], [0, 0, 1, 1], [], []>} : vector<2x24xf32>, vector<24x32xf32>, vector<2x32xf32> -> vector<2x32xf32>
    %76 = arith.addf %74, %75 : vector<2x32xf32>
    %77 = vector.broadcast %10 : vector<1x32xf32> to vector<2x32xf32>
    %78 = arith.addf %76, %77 : vector<2x32xf32>
    %cst_57 = arith.constant 0.000000e+00 : f32
    %79 = vector.broadcast %cst_57 : f32 to vector<2x32xf32>
    %80 = arith.cmpf ogt, %78, %79 : vector<2x32xf32>
    %cst_58 = arith.constant 0.000000e+00 : f32
    %81 = vector.broadcast %cst_58 : f32 to vector<2x32xf32>
    %82 = arith.minimumf %78, %81 : vector<2x32xf32>
    %83 = math.exp %82 : vector<2x32xf32>
    %cst_59 = arith.constant 1.000000e+00 : f32
    %84 = vector.broadcast %cst_59 : f32 to vector<2x32xf32>
    %85 = arith.subf %83, %84 : vector<2x32xf32>
    %86 = arith.select %80, %78, %85 : vector<2x32xi1>, vector<2x32xf32>
    %cst_60 = arith.constant dense<0.000000e+00> : vector<2x32xf32>
    %87 = tpu.matmul %86, %11, %cst_60 {dimension_numbers = #tpu.dot_dimension_numbers<[1], [0], [0], [1], [0, 0, 1, 1], [], []>} : vector<2x32xf32>, vector<32x32xf32>, vector<2x32xf32> -> vector<2x32xf32>
    %88 = vector.broadcast %12 : vector<1x32xf32> to vector<2x32xf32>
    %89 = arith.addf %87, %88 : vector<2x32xf32>
    %cst_61 = arith.constant 0.000000e+00 : f32
    %90 = vector.broadcast %cst_61 : f32 to vector<2x32xf32>
    %91 = arith.cmpf ogt, %89, %90 : vector<2x32xf32>
    %cst_62 = arith.constant 0.000000e+00 : f32
    %92 = vector.broadcast %cst_62 : f32 to vector<2x32xf32>
    %93 = arith.minimumf %89, %92 : vector<2x32xf32>
    %94 = math.exp %93 : vector<2x32xf32>
    %cst_63 = arith.constant 1.000000e+00 : f32
    %95 = vector.broadcast %cst_63 : f32 to vector<2x32xf32>
    %96 = arith.subf %94, %95 : vector<2x32xf32>
    %97 = arith.select %91, %89, %96 : vector<2x32xi1>, vector<2x32xf32>
    %98 = vector.extract_strided_slice %0 {offsets = [0, 0], sizes = [2, 5], strides = [1, 1]} : vector<2x40xf32> to vector<2x5xf32>
    %cst_64 = arith.constant dense<0.000000e+00> : vector<2x32xf32>
    %99 = tpu.matmul %98, %13, %cst_64 {dimension_numbers = #tpu.dot_dimension_numbers<[1], [0], [0], [1], [0, 0, 1, 1], [], []>} : vector<2x5xf32>, vector<5x32xf32>, vector<2x32xf32> -> vector<2x32xf32>
    %cst_65 = arith.constant dense<0.000000e+00> : vector<2x32xf32>
    %100 = tpu.matmul %72, %14, %cst_65 {dimension_numbers = #tpu.dot_dimension_numbers<[1], [0], [0], [1], [0, 0, 1, 1], [], []>} : vector<2x24xf32>, vector<24x32xf32>, vector<2x32xf32> -> vector<2x32xf32>
    %101 = arith.addf %99, %100 : vector<2x32xf32>
    %102 = vector.broadcast %16 : vector<1x32xf32> to vector<2x32xf32>
    %103 = arith.addf %101, %102 : vector<2x32xf32>
    %104 = vector.extract_strided_slice %0 {offsets = [0, 29], sizes = [2, 11], strides = [1, 1]} : vector<2x40xf32> to vector<2x11xf32>
    %cst_66 = arith.constant dense<0.000000e+00> : vector<2x32xf32>
    %105 = tpu.matmul %104, %15, %cst_66 {dimension_numbers = #tpu.dot_dimension_numbers<[1], [0], [0], [1], [0, 0, 1, 1], [], []>} : vector<2x11xf32>, vector<11x32xf32>, vector<2x32xf32> -> vector<2x32xf32>
    %106 = arith.addf %103, %105 : vector<2x32xf32>
    %cst_67 = arith.constant 0.000000e+00 : f32
    %107 = vector.broadcast %cst_67 : f32 to vector<2x32xf32>
    %108 = arith.cmpf ogt, %106, %107 : vector<2x32xf32>
    %cst_68 = arith.constant 0.000000e+00 : f32
    %109 = vector.broadcast %cst_68 : f32 to vector<2x32xf32>
    %110 = arith.minimumf %106, %109 : vector<2x32xf32>
    %111 = math.exp %110 : vector<2x32xf32>
    %cst_69 = arith.constant 1.000000e+00 : f32
    %112 = vector.broadcast %cst_69 : f32 to vector<2x32xf32>
    %113 = arith.subf %111, %112 : vector<2x32xf32>
    %114 = arith.select %108, %106, %113 : vector<2x32xi1>, vector<2x32xf32>
    %cst_70 = arith.constant dense<0.000000e+00> : vector<2x32xf32>
    %115 = tpu.matmul %114, %17, %cst_70 {dimension_numbers = #tpu.dot_dimension_numbers<[1], [0], [0], [1], [0, 0, 1, 1], [], []>} : vector<2x32xf32>, vector<32x32xf32>, vector<2x32xf32> -> vector<2x32xf32>
    %116 = vector.broadcast %18 : vector<1x32xf32> to vector<2x32xf32>
    %117 = arith.addf %115, %116 : vector<2x32xf32>
    %cst_71 = arith.constant 0.000000e+00 : f32
    %118 = vector.broadcast %cst_71 : f32 to vector<2x32xf32>
    %119 = arith.cmpf ogt, %117, %118 : vector<2x32xf32>
    %cst_72 = arith.constant 0.000000e+00 : f32
    %120 = vector.broadcast %cst_72 : f32 to vector<2x32xf32>
    %121 = arith.minimumf %117, %120 : vector<2x32xf32>
    %122 = math.exp %121 : vector<2x32xf32>
    %cst_73 = arith.constant 1.000000e+00 : f32
    %123 = vector.broadcast %cst_73 : f32 to vector<2x32xf32>
    %124 = arith.subf %122, %123 : vector<2x32xf32>
    %125 = arith.select %119, %117, %124 : vector<2x32xi1>, vector<2x32xf32>
    %cst_74 = arith.constant dense<0.000000e+00> : vector<2x1xf32>
    %126 = tpu.matmul %125, %19, %cst_74 {dimension_numbers = #tpu.dot_dimension_numbers<[1], [0], [0], [1], [0, 0, 1, 1], [], []>} : vector<2x32xf32>, vector<32x1xf32>, vector<2x1xf32> -> vector<2x1xf32>
    %127 = vector.broadcast %20 : vector<1x1xf32> to vector<2x1xf32>
    %128 = arith.addf %126, %127 : vector<2x1xf32>
    %cst_75 = arith.constant dense<0.000000e+00> : vector<2x6xf32>
    %129 = tpu.matmul %97, %21, %cst_75 {dimension_numbers = #tpu.dot_dimension_numbers<[1], [0], [0], [1], [0, 0, 1, 1], [], []>} : vector<2x32xf32>, vector<32x6xf32>, vector<2x6xf32> -> vector<2x6xf32>
    %130 = vector.broadcast %22 : vector<1x6xf32> to vector<2x6xf32>
    %131 = arith.addf %129, %130 : vector<2x6xf32>
    %132 = math.exp %23 : vector<1x6xf32>
    %cst_76 = arith.constant 1.41893852 : f32
    %133 = vector.broadcast %cst_76 : f32 to vector<1x6xf32>
    %134 = arith.addf %133, %23 : vector<1x6xf32>
    %cst_77 = arith.constant dense<0.000000e+00> : vector<1xf32>
    %135 = vector.multi_reduction <add>, %134, %cst_77 [1] : vector<1x6xf32> to vector<1xf32>
    %136 = vector.shape_cast %135 : vector<1xf32> to vector<1x1xf32>
    %cst_78 = arith.constant dense<0.000000e+00> : vector<1xf32>
    %137 = vector.multi_reduction <add>, %23, %cst_78 [1] : vector<1x6xf32> to vector<1xf32>
    %138 = vector.shape_cast %137 : vector<1xf32> to vector<1x1xf32>
    %139 = arith.subf %1, %131 : vector<2x6xf32>
    %cst_79 = arith.constant -2.000000e+00 : f32
    %140 = vector.broadcast %cst_79 : f32 to vector<1x6xf32>
    %141 = arith.mulf %140, %23 : vector<1x6xf32>
    %142 = math.exp %141 : vector<1x6xf32>
    %cst_80 = arith.constant 5.000000e-01 : f32
    %143 = vector.broadcast %cst_80 : f32 to vector<1x6xf32>
    %144 = arith.mulf %143, %142 : vector<1x6xf32>
    %145 = arith.mulf %139, %139 : vector<2x6xf32>
    %146 = vector.broadcast %144 : vector<1x6xf32> to vector<2x6xf32>
    %147 = arith.mulf %145, %146 : vector<2x6xf32>
    %cst_81 = arith.constant dense<0.000000e+00> : vector<2xf32>
    %148 = vector.multi_reduction <add>, %147, %cst_81 [1] : vector<2x6xf32> to vector<2xf32>
    %149 = vector.shape_cast %148 : vector<2xf32> to vector<2x1xf32>
    %150 = vector.broadcast %138 : vector<1x1xf32> to vector<2x1xf32>
    %151 = arith.addf %149, %150 : vector<2x1xf32>
    %cst_82 = arith.constant 5.51363134 : f32
    %152 = vector.broadcast %cst_82 : f32 to vector<2x1xf32>
    %153 = arith.addf %151, %152 : vector<2x1xf32>
    %cst_83 = arith.constant 0.000000e+00 : f32
    %154 = vector.broadcast %cst_83 : f32 to vector<2x128xf32>
    %c0_84 = arith.constant 0 : index
    %c0_85 = arith.constant 0 : index
    %155 = vector.load %arg25[%c0_84, %c0_85] : memref<2x128xf32, #tpu.memory_space<vmem>>, vector<2x128xf32>
    tpu.vector_store %arg25[%c0_84, %c0_85], %154 {strides = array<i32>} : memref<2x128xf32, #tpu.memory_space<vmem>>, vector<2x128xf32>,
    %c0_86 = arith.constant 0 : index
    %c0_87 = arith.constant 0 : index
    %156 = vector.load %arg25[%c0_86, %c0_87] : memref<2x128xf32, #tpu.memory_space<vmem>>, vector<2x6xf32>
    tpu.vector_store %arg25[%c0_86, %c0_87], %131 {strides = array<i32>} : memref<2x128xf32, #tpu.memory_space<vmem>>, vector<2x6xf32>,
    %157 = vector.shape_cast %132 : vector<1x6xf32> to vector<1x6xf32>
    %158 = vector.broadcast %157 : vector<1x6xf32> to vector<2x6xf32>
    %c0_88 = arith.constant 0 : index
    %c6 = arith.constant 6 : index
    %159 = vector.load %arg25[%c0_88, %c6] : memref<2x128xf32, #tpu.memory_space<vmem>>, vector<2x6xf32>
    tpu.vector_store %arg25[%c0_88, %c6], %158 {strides = array<i32>} : memref<2x128xf32, #tpu.memory_space<vmem>>, vector<2x6xf32>,
    %c0_89 = arith.constant 0 : index
    %c12 = arith.constant 12 : index
    %160 = vector.load %arg25[%c0_89, %c12] : memref<2x128xf32, #tpu.memory_space<vmem>>, vector<2x1xf32>
    tpu.vector_store %arg25[%c0_89, %c12], %128 {strides = array<i32>} : memref<2x128xf32, #tpu.memory_space<vmem>>, vector<2x1xf32>,
    %161 = vector.shape_cast %136 : vector<1x1xf32> to vector<1x1xf32>
    %162 = vector.broadcast %161 : vector<1x1xf32> to vector<2x1xf32>
    %c0_90 = arith.constant 0 : index
    %c13 = arith.constant 13 : index
    %163 = vector.load %arg25[%c0_90, %c13] : memref<2x128xf32, #tpu.memory_space<vmem>>, vector<2x1xf32>
    tpu.vector_store %arg25[%c0_90, %c13], %162 {strides = array<i32>} : memref<2x128xf32, #tpu.memory_space<vmem>>, vector<2x1xf32>,
    %c0_91 = arith.constant 0 : index
    %c14 = arith.constant 14 : index
    %164 = vector.load %arg25[%c0_91, %c14] : memref<2x128xf32, #tpu.memory_space<vmem>>, vector<2x1xf32>
    tpu.vector_store %arg25[%c0_91, %c14], %153 {strides = array<i32>} : memref<2x128xf32, #tpu.memory_space<vmem>>, vector<2x1xf32>,
    return
  }
  func.func @transform_0(%arg0: i32) -> (i32, i32) {
    %c0_i32 = arith.constant 0 : i32
    %c0_i32_0 = arith.constant 0 : i32
    return %arg0, %c0_i32 : i32, i32
  }
  func.func @transform_1(%arg0: i32) -> (i32, i32) {
    %c0_i32 = arith.constant 0 : i32
    %c0_i32_0 = arith.constant 0 : i32
    return %arg0, %c0_i32 : i32, i32
  }
  func.func @transform_2(%arg0: i32) -> (i32, i32) {
    %c0_i32 = arith.constant 0 : i32
    %c0_i32_0 = arith.constant 0 : i32
    %c0_i32_1 = arith.constant 0 : i32
    return %c0_i32, %c0_i32_0 : i32, i32
  }
  func.func @transform_3(%arg0: i32) -> (i32, i32) {
    %c0_i32 = arith.constant 0 : i32
    %c0_i32_0 = arith.constant 0 : i32
    %c0_i32_1 = arith.constant 0 : i32
    return %c0_i32, %c0_i32_0 : i32, i32
  }
  func.func @transform_4(%arg0: i32) -> (i32, i32) {
    %c0_i32 = arith.constant 0 : i32
    %c0_i32_0 = arith.constant 0 : i32
    %c0_i32_1 = arith.constant 0 : i32
    return %c0_i32, %c0_i32_0 : i32, i32
  }
  func.func @transform_5(%arg0: i32) -> (i32, i32) {
    %c0_i32 = arith.constant 0 : i32
    %c0_i32_0 = arith.constant 0 : i32
    %c0_i32_1 = arith.constant 0 : i32
    return %c0_i32, %c0_i32_0 : i32, i32
  }
  func.func @transform_6(%arg0: i32) -> (i32, i32) {
    %c0_i32 = arith.constant 0 : i32
    %c0_i32_0 = arith.constant 0 : i32
    %c0_i32_1 = arith.constant 0 : i32
    return %c0_i32, %c0_i32_0 : i32, i32
  }
  func.func @transform_7(%arg0: i32) -> (i32, i32) {
    %c0_i32 = arith.constant 0 : i32
    %c0_i32_0 = arith.constant 0 : i32
    %c0_i32_1 = arith.constant 0 : i32
    return %c0_i32, %c0_i32_0 : i32, i32
  }
  func.func @transform_8(%arg0: i32) -> (i32, i32) {
    %c0_i32 = arith.constant 0 : i32
    %c0_i32_0 = arith.constant 0 : i32
    %c0_i32_1 = arith.constant 0 : i32
    return %c0_i32, %c0_i32_0 : i32, i32
  }
  func.func @transform_9(%arg0: i32) -> (i32, i32) {
    %c0_i32 = arith.constant 0 : i32
    %c0_i32_0 = arith.constant 0 : i32
    %c0_i32_1 = arith.constant 0 : i32
    return %c0_i32, %c0_i32_0 : i32, i32
  }
  func.func @transform_10(%arg0: i32) -> (i32, i32) {
    %c0_i32 = arith.constant 0 : i32
    %c0_i32_0 = arith.constant 0 : i32
    %c0_i32_1 = arith.constant 0 : i32
    return %c0_i32, %c0_i32_0 : i32, i32
  }
  func.func @transform_11(%arg0: i32) -> (i32, i32) {
    %c0_i32 = arith.constant 0 : i32
    %c0_i32_0 = arith.constant 0 : i32
    %c0_i32_1 = arith.constant 0 : i32
    return %c0_i32, %c0_i32_0 : i32, i32
  }
  func.func @transform_12(%arg0: i32) -> (i32, i32) {
    %c0_i32 = arith.constant 0 : i32
    %c0_i32_0 = arith.constant 0 : i32
    %c0_i32_1 = arith.constant 0 : i32
    return %c0_i32, %c0_i32_0 : i32, i32
  }
  func.func @transform_13(%arg0: i32) -> (i32, i32) {
    %c0_i32 = arith.constant 0 : i32
    %c0_i32_0 = arith.constant 0 : i32
    %c0_i32_1 = arith.constant 0 : i32
    return %c0_i32, %c0_i32_0 : i32, i32
  }
  func.func @transform_14(%arg0: i32) -> (i32, i32) {
    %c0_i32 = arith.constant 0 : i32
    %c0_i32_0 = arith.constant 0 : i32
    %c0_i32_1 = arith.constant 0 : i32
    return %c0_i32, %c0_i32_0 : i32, i32
  }
  func.func @transform_15(%arg0: i32) -> (i32, i32) {
    %c0_i32 = arith.constant 0 : i32
    %c0_i32_0 = arith.constant 0 : i32
    %c0_i32_1 = arith.constant 0 : i32
    return %c0_i32, %c0_i32_0 : i32, i32
  }
  func.func @transform_16(%arg0: i32) -> (i32, i32) {
    %c0_i32 = arith.constant 0 : i32
    %c0_i32_0 = arith.constant 0 : i32
    %c0_i32_1 = arith.constant 0 : i32
    return %c0_i32, %c0_i32_0 : i32, i32
  }
  func.func @transform_17(%arg0: i32) -> (i32, i32) {
    %c0_i32 = arith.constant 0 : i32
    %c0_i32_0 = arith.constant 0 : i32
    %c0_i32_1 = arith.constant 0 : i32
    return %c0_i32, %c0_i32_0 : i32, i32
  }
  func.func @transform_18(%arg0: i32) -> (i32, i32) {
    %c0_i32 = arith.constant 0 : i32
    %c0_i32_0 = arith.constant 0 : i32
    %c0_i32_1 = arith.constant 0 : i32
    return %c0_i32, %c0_i32_0 : i32, i32
  }
  func.func @transform_19(%arg0: i32) -> (i32, i32) {
    %c0_i32 = arith.constant 0 : i32
    %c0_i32_0 = arith.constant 0 : i32
    %c0_i32_1 = arith.constant 0 : i32
    return %c0_i32, %c0_i32_0 : i32, i32
  }
  func.func @transform_20(%arg0: i32) -> (i32, i32) {
    %c0_i32 = arith.constant 0 : i32
    %c0_i32_0 = arith.constant 0 : i32
    %c0_i32_1 = arith.constant 0 : i32
    return %c0_i32, %c0_i32_0 : i32, i32
  }
  func.func @transform_21(%arg0: i32) -> (i32, i32) {
    %c0_i32 = arith.constant 0 : i32
    %c0_i32_0 = arith.constant 0 : i32
    %c0_i32_1 = arith.constant 0 : i32
    return %c0_i32, %c0_i32_0 : i32, i32
  }
  func.func @transform_22(%arg0: i32) -> (i32, i32) {
    %c0_i32 = arith.constant 0 : i32
    %c0_i32_0 = arith.constant 0 : i32
    %c0_i32_1 = arith.constant 0 : i32
    return %c0_i32, %c0_i32_0 : i32, i32
  }
  func.func @transform_23(%arg0: i32) -> (i32, i32) {
    %c0_i32 = arith.constant 0 : i32
    %c0_i32_0 = arith.constant 0 : i32
    %c0_i32_1 = arith.constant 0 : i32
    return %c0_i32, %c0_i32_0 : i32, i32
  }
  func.func @transform_24(%arg0: i32) -> (i32, i32) {
    %c0_i32 = arith.constant 0 : i32
    %c0_i32_0 = arith.constant 0 : i32
    return %arg0, %c0_i32 : i32, i32
  }
}

</mosaic_0001>

<bundles_post_ra>
// kernel: tpu_custom_call.1
= control target key start
LH: loop header
LB: loop body
LE: loop exit
PB: predicated region body
PF: predicated region fallthrough
CT: control target
= control target key end

     0   :  { %s2475_s0 = inlined_call_operand.hbm [shape: f32[2,40], index: 0, kind: input, shape index: {}]   ;;  %s2476_s1 = inlined_call_operand.hbm [shape: f32[2,6], index: 1, kind: input, shape index: {}]   ;;  %s2477_s2 = inlined_call_operand.hbm [shape: f32[3,24], index: 2, kind: input, shape index: {}]   ;;  %s2478_s3 = inlined_call_operand.hbm [shape: f32[1,24], index: 3, kind: input, shape index: {}]   ;;  %s2479_s4 = inlined_call_operand.vmem [shape: f32[24,24], index: 4, kind: input, shape index: {}]   ;;  %s2480_s5 = inlined_call_operand.vmem [shape: f32[1,24], index: 5, kind: input, shape index: {}]   ;;  %s2481_s6 = inlined_call_operand.hbm [shape: f32[24,24], index: 6, kind: input, shape index: {}]   ;;  %s2482_s7 = inlined_call_operand.hbm [shape: f32[1,24], index: 7, kind: input, shape index: {}]   ;;  %s2483_s8 = inlined_call_operand.hbm [shape: f32[5,32], index: 8, kind: input, shape index: {}]   ;;  %s2484_s9 = inlined_call_operand.hbm [shape: f32[24,32], index: 9, kind: input, shape index: {}]   ;;  %s2485_s10 = inlined_call_operand.hbm [shape: f32[1,32], index: 10, kind: input, shape index: {}]   ;;  %s2486_s11 = inlined_call_operand.vmem [shape: f32[32,32], index: 11, kind: input, shape index: {}]   ;;  %s2487_s12 = inlined_call_operand.hbm [shape: f32[1,32], index: 12, kind: input, shape index: {}]   ;;  %s2488_s13 = inlined_call_operand.hbm [shape: f32[5,32], index: 13, kind: input, shape index: {}]   ;;  %s2489_s14 = inlined_call_operand.vmem [shape: f32[24,32], index: 14, kind: input, shape index: {}]   ;;  %s2490_s15 = inlined_call_operand.vmem [shape: f32[11,32], index: 15, kind: input, shape index: {}]   ;;  %s2491_s16 = inlined_call_operand.hbm [shape: f32[1,32], index: 16, kind: input, shape index: {}]   ;;  %s2492_s17 = inlined_call_operand.vmem [shape: f32[32,32], index: 17, kind: input, shape index: {}]   ;;  %s2493_s18 = inlined_call_operand.vmem [shape: f32[1,32], index: 18, kind: input, shape index: {}]   ;;  %s2494_s19 = inlined_call_operand.vmem [shape: f32[32,1], index: 19, kind: input, shape index: {}]   ;;  %s2495_s20 = inlined_call_operand.<no memory space> [shape: f32[1,1], index: 20, kind: input, shape index: {}]   ;;  %s2496_s21 = inlined_call_operand.vmem [shape: f32[32,6], index: 21, kind: input, shape index: {}]   ;;  %s2497_s22 = inlined_call_operand.vmem [shape: f32[1,6], index: 22, kind: input, shape index: {}]   ;;  %s2498_s23 = inlined_call_operand.vmem [shape: f32[1,6], index: 23, kind: input, shape index: {}]   ;;  %s2499_s24 = inlined_call_operand.hbm [shape: f32[2,128], index: 24, kind: output, shape index: {}]  }
   0x1   :  { %2508 = sst [smem:[#allocation32_spill]] %s2475_s0  ;;  %v29_v0 = vstv %s2495_s20 }
   0x2   :  { %2509 = sst [smem:[#allocation33_spill]] %s2476_s1  ;;  %30 = vst [vmem:[#allocation2] sm:$0x1] %v29_v0 }
   0x3   :  { %2510 = sst [smem:[#allocation34_spill]] %s2477_s2 }
   0x4   :  { %2511 = sst [smem:[#allocation35_spill]] %s2478_s3 }
   0x5   :  { %2512 = sst [smem:[#allocation36_spill]] %s2479_s4 }
   0x6   :  { %2513 = sst [smem:[#allocation37_spill]] %s2480_s5 }
   0x7   :  { %2514 = sst [smem:[#allocation38_spill]] %s2481_s6 }
   0x8   :  { %2515 = sst [smem:[#allocation39_spill]] %s2482_s7 }
   0x9   :  { %2516 = sst [smem:[#allocation40_spill]] %s2483_s8 }
   0xa   :  { %31 = vsyncpa [#allocation4], 0 }
   0xb   :  { %32 = vsyncpa [#allocation7], 0 }
   0xc   :  { %33 = vsyncpa [#allocation10], 0 }
   0xd   :  { %34 = vsyncpa [#allocation13], 0 }
   0xe   :  { %35 = vsyncpa [#allocation16], 0 }
   0xf   :  { %36 = vsyncpa [#allocation19], 0 }
  0x10   :  { %37 = vsyncpa [#allocation22], 0 }
  0x11   :  { %38 = vsyncpa [#allocation5], 0  ;;  %s2010_s27 = smov [#allocation6]   ;;  %s2011_s6 = smov [#allocation9]  }
  0x12   :  { %s55_s28 = sshll.u32 %s2010_s27, 4  ;;  %s75_s2 = sshll.u32 %s2011_s6, 4  ;;  %s56_s28 = int_to_ptr.vmem [resolvable:$true] %s55_s28  ;;  %s76_s2 = int_to_ptr.vmem [resolvable:$true] %s75_s2 }
  0x13   :  { %s2517_s7 = sld [smem:[#allocation33_spill]] }
  0x19   :  { %s1708_s30 = scalar_lea.hbm %s2517_s7, 32 }
  0x1a   :  { %p1709_p0 = scmp.ne.s32.totalorder %s2517_s7, %s1708_s30  ;;  %p1712_p1 = scmp.lt.u32.totalorder %s1708_s30, %s2517_s7 }
  0x1c   :  { %p1714_p2 = pnand %p1712_p1, %p1709_p0 }
  0x1e   :  { %1717 = shalt.err (!%p1714_p2)
}
  0x1f   :  { %s1718_s4 = scalar_lea.vmem %s56_s28, 32  ;;  %p1723_p4 = scmp.lt.s32.totalorder %s56_s28, %s56_s28 }
  0x20   :  { %p1719_p3 = scmp.ne.s32.totalorder %s56_s28, %s1718_s4  ;;  %p1724_p5 = scmp.lt.s32.totalorder %s1718_s4, %s1718_s4 }
  0x22   :  { %p1725_p6 = por %p1724_p5, %p1723_p4 }
  0x24   :  { %p1726_p7 = pnand %p1725_p6, %p1719_p3 }
  0x26   :  { %1729 = shalt.err (!%p1726_p7)
}
  0x27   :  { %58 = dma.hbm_to_vmem [thread:$0]  %s2517_s7, 32, %s56_s28, [#allocation7]  }
  0x28   :  { %s2518_s6 = sld [smem:[#allocation35_spill]] }
  0x2e   :  { %s1730_s29 = scalar_lea.hbm %s2518_s6, 16 }
  0x2f   :  { %p1731_p8 = scmp.ne.s32.totalorder %s2518_s6, %s1730_s29  ;;  %p1734_p9 = scmp.lt.u32.totalorder %s1730_s29, %s2518_s6 }
  0x31   :  { %p1736_p10 = pnand %p1734_p9, %p1731_p8 }
  0x33   :  { %1739 = shalt.err (!%p1736_p10)
}
  0x34   :  { %s1740_s25 = scalar_lea.vmem %s76_s2, 16  ;;  %s1744_s8 = scalar_lea.vmem %s76_s2, 32 }
  0x35   :  { %p1741_p11 = scmp.ne.s32.totalorder %s76_s2, %s1740_s25  ;;  %p1745_p12 = scmp.lt.s32.totalorder %s76_s2, %s76_s2 }
  0x36   :  { %p1746_p13 = scmp.lt.s32.totalorder %s1744_s8, %s1740_s25 }
  0x38   :  { %p1747_p0 = por %p1746_p13, %p1745_p12 }
  0x3a   :  { %p1748_p1 = pnand %p1747_p0, %p1741_p11 }
  0x3c   :  { %1751 = shalt.err (!%p1748_p1)
}
  0x3d   :  { %78 = dma.hbm_to_vmem [thread:$0]  %s2518_s6, 16, %s76_s2, [#allocation10]  }
  0x3e   :  { %s2012_s4 = smov [#allocation12]   ;;  %s2519_s27 = sld [smem:[#allocation39_spill]] }
  0x3f   :  { %s101_s1 = sshll.u32 %s2012_s4, 4  ;;  %s102_s1 = int_to_ptr.vmem [resolvable:$true] %s101_s1 }
  0x44   :  { %s1752_s29 = scalar_lea.hbm %s2519_s27, 16 }
  0x45   :  { %p1753_p2 = scmp.ne.s32.totalorder %s2519_s27, %s1752_s29  ;;  %p1756_p3 = scmp.lt.u32.totalorder %s1752_s29, %s2519_s27 }
  0x47   :  { %p1758_p4 = pnand %p1756_p3, %p1753_p2 }
  0x49   :  { %1761 = shalt.err (!%p1758_p4)
}
  0x4a   :  { %s1762_s25 = scalar_lea.vmem %s102_s1, 16  ;;  %s1766_s2 = scalar_lea.vmem %s102_s1, 32 }
  0x4b   :  { %p1763_p5 = scmp.ne.s32.totalorder %s102_s1, %s1762_s25  ;;  %p1767_p6 = scmp.lt.s32.totalorder %s102_s1, %s102_s1 }
  0x4c   :  { %p1768_p7 = scmp.lt.s32.totalorder %s1766_s2, %s1762_s25 }
  0x4e   :  { %p1769_p8 = por %p1768_p7, %p1767_p6 }
  0x50   :  { %p1770_p9 = pnand %p1769_p8, %p1763_p5 }
  0x52   :  { %1773 = shalt.err (!%p1770_p9)
}
  0x53   :  { %104 = dma.hbm_to_vmem [thread:$0]  %s2519_s27, 16, %s102_s1, [#allocation13]  }
  0x54   :  { %s2013_s28 = smov [#allocation15]   ;;  %s2014_s4 = smov [#allocation18]  }
  0x55   :  { %s120_s7 = sshll.u32 %s2013_s28, 4  ;;  %s145_s5 = sshll.u32 %s2014_s4, 4  ;;  %s121_s7 = int_to_ptr.vmem [resolvable:$true] %s120_s7  ;;  %s146_s5 = int_to_ptr.vmem [resolvable:$true] %s145_s5 }
  0x56   :  { %s1774_s0 = scalar_lea.hbm %s2484_s9, 384 }
  0x57   :  { %p1775_p10 = scmp.ne.s32.totalorder %s2484_s9, %s1774_s0  ;;  %p1778_p11 = scmp.lt.u32.totalorder %s1774_s0, %s2484_s9 }
  0x59   :  { %p1780_p12 = pnand %p1778_p11, %p1775_p10 }
  0x5b   :  { %1783 = shalt.err (!%p1780_p12)
}
  0x5c   :  { %s1784_s1 = scalar_lea.vmem %s121_s7, 384  ;;  %p1789_p0 = scmp.lt.s32.totalorder %s121_s7, %s121_s7 }
  0x5d   :  { %p1785_p13 = scmp.ne.s32.totalorder %s121_s7, %s1784_s1  ;;  %p1790_p1 = scmp.lt.s32.totalorder %s1784_s1, %s1784_s1 }
  0x5f   :  { %p1791_p2 = por %p1790_p1, %p1789_p0 }
  0x61   :  { %p1792_p3 = pnand %p1791_p2, %p1785_p13 }
  0x63   :  { %1795 = shalt.err (!%p1792_p3)
}
  0x64   :  { %s2015_s27 = smov 128   ;;  %s2016_s2 = smov 8  }
  0x65   :  { %126 = dma.hbm_to_vmem [thread:$0]  %s2484_s9, 384, %s121_s7, [#allocation16], %s2015_s27, %s2015_s27, %s2016_s2  }
  0x66   :  { %s1796_s26 = scalar_lea.hbm %s2487_s12, 16 }
  0x67   :  { %p1797_p4 = scmp.ne.s32.totalorder %s2487_s12, %s1796_s26  ;;  %p1800_p5 = scmp.lt.u32.totalorder %s1796_s26, %s2487_s12 }
  0x69   :  { %p1802_p6 = pnand %p1800_p5, %p1797_p4 }
  0x6b   :  { %1805 = shalt.err (!%p1802_p6)
}
  0x6c   :  { %s1806_s3 = scalar_lea.vmem %s146_s5, 16  ;;  %s1810_s25 = scalar_lea.vmem %s146_s5, 32 }
  0x6d   :  { %p1807_p7 = scmp.ne.s32.totalorder %s146_s5, %s1806_s3  ;;  %p1811_p8 = scmp.lt.s32.totalorder %s146_s5, %s146_s5 }
  0x6e   :  { %p1812_p9 = scmp.lt.s32.totalorder %s1810_s25, %s1806_s3 }
  0x70   :  { %p1813_p10 = por %p1812_p9, %p1811_p8 }
  0x72   :  { %p1814_p11 = pnand %p1813_p10, %p1807_p7 }
  0x74   :  { %1817 = shalt.err (!%p1814_p11)
}
  0x75   :  { %148 = dma.hbm_to_vmem [thread:$0]  %s2487_s12, 16, %s146_s5, [#allocation19]  }
  0x76   :  { %s2017_s1 = smov [#allocation3]   ;;  %s2018_s8 = smov [#allocation8]  }
  0x77   :  { %s45_s6 = sshll.u32 %s2017_s1, 4  ;;  %s65_s28 = sshll.u32 %s2018_s8, 4  ;;  %s46_s6 = int_to_ptr.vmem [resolvable:$true] %s45_s6  ;;  %s66_s28 = int_to_ptr.vmem [resolvable:$true] %s65_s28 }
  0x78   :  { %s2520_s29 = sld [smem:[#allocation32_spill]] }
  0x7e   :  { %s1818_s0 = scalar_lea.hbm %s2520_s29, 32 }
  0x7f   :  { %p1819_p12 = scmp.ne.s32.totalorder %s2520_s29, %s1818_s0  ;;  %p1822_p13 = scmp.lt.u32.totalorder %s1818_s0, %s2520_s29 }
  0x81   :  { %p1824_p0 = pnand %p1822_p13, %p1819_p12 }
  0x83   :  { %1827 = shalt.err (!%p1824_p0)
}
  0x84   :  { %s1828_s12 = scalar_lea.vmem %s46_s6, 32  ;;  %p1833_p2 = scmp.lt.s32.totalorder %s46_s6, %s46_s6 }
  0x85   :  { %p1829_p1 = scmp.ne.s32.totalorder %s46_s6, %s1828_s12  ;;  %p1834_p3 = scmp.lt.s32.totalorder %s1828_s12, %s1828_s12 }
  0x87   :  { %p1835_p4 = por %p1834_p3, %p1833_p2 }
  0x89   :  { %p1836_p5 = pnand %p1835_p4, %p1829_p1 }
  0x8b   :  { %1839 = shalt.err (!%p1836_p5)
}
  0x8c   :  { %48 = dma.hbm_to_vmem [thread:$0]  %s2520_s29, 32, %s46_s6, [#allocation4]  }
  0x8d   :  { %s2521_s8 = sld [smem:[#allocation34_spill]] }
  0x93   :  { %s1840_s4 = scalar_lea.hbm %s2521_s8, 64 }
  0x94   :  { %p1841_p6 = scmp.ne.s32.totalorder %s2521_s8, %s1840_s4  ;;  %p1844_p7 = scmp.lt.u32.totalorder %s1840_s4, %s2521_s8 }
  0x96   :  { %p1846_p8 = pnand %p1844_p7, %p1841_p6 }
  0x98   :  { %1849 = shalt.err (!%p1846_p8)
}
  0x99   :  { %s1850_s3 = scalar_lea.vmem %s66_s28, 64  ;;  %p1855_p10 = scmp.lt.s32.totalorder %s66_s28, %s66_s28 }
  0x9a   :  { %p1851_p9 = scmp.ne.s32.totalorder %s66_s28, %s1850_s3  ;;  %p1856_p11 = scmp.lt.s32.totalorder %s1850_s3, %s1850_s3 }
  0x9c   :  { %p1857_p12 = por %p1856_p11, %p1855_p10 }
  0x9e   :  { %p1858_p13 = pnand %p1857_p12, %p1851_p9 }
  0xa0   :  { %1861 = shalt.err (!%p1858_p13)
}
  0xa1   :  { %68 = dma.hbm_to_vmem [thread:$0]  %s2521_s8, 64, %s66_s28, [#allocation7]  }
  0xa2   :  { %s2019_s25 = smov [#allocation11]   ;;  %s2020_s5 = smov [#allocation14]  }
  0xa3   :  { %s88_s12 = sshll.u32 %s2019_s25, 4  ;;  %s111_s9 = sshll.u32 %s2020_s5, 4  ;;  %s89_s12 = int_to_ptr.vmem [resolvable:$true] %s88_s12  ;;  %s112_s9 = int_to_ptr.vmem [resolvable:$true] %s111_s9 }
  0xa4   :  { %s2522_s4 = sld [smem:[#allocation38_spill]] }
  0xaa   :  { %s1862_s26 = scalar_lea.hbm %s2522_s4, 384 }
  0xab   :  { %p1863_p0 = scmp.ne.s32.totalorder %s2522_s4, %s1862_s26  ;;  %p1866_p1 = scmp.lt.u32.totalorder %s1862_s26, %s2522_s4 }
  0xad   :  { %p1868_p2 = pnand %p1866_p1, %p1863_p0 }
  0xaf   :  { %1871 = shalt.err (!%p1868_p2)
}
  0xb0   :  { %s1872_s28 = scalar_lea.vmem %s89_s12, 384  ;;  %p1877_p4 = scmp.lt.s32.totalorder %s89_s12, %s89_s12 }
  0xb1   :  { %p1873_p3 = scmp.ne.s32.totalorder %s89_s12, %s1872_s28  ;;  %p1878_p5 = scmp.lt.s32.totalorder %s1872_s28, %s1872_s28 }
  0xb3   :  { %p1879_p6 = por %p1878_p5, %p1877_p4 }
  0xb5   :  { %p1880_p7 = pnand %p1879_p6, %p1873_p3 }
  0xb7   :  { %1883 = shalt.err (!%p1880_p7)
}
  0xb8   :  { %94 = dma.hbm_to_vmem [thread:$0]  %s2522_s4, 384, %s89_s12, [#allocation10], %s2015_s27, %s2015_s27, %s2016_s2  }
  0xb9   :  { %s2523_s5 = sld [smem:[#allocation40_spill]] }
  0xbf   :  { %s1884_s7 = scalar_lea.hbm %s2523_s5, 128 }
  0xc0   :  { %p1885_p8 = scmp.ne.s32.totalorder %s2523_s5, %s1884_s7  ;;  %p1888_p9 = scmp.lt.u32.totalorder %s1884_s7, %s2523_s5 }
  0xc2   :  { %p1890_p10 = pnand %p1888_p9, %p1885_p8 }
  0xc4   :  { %1893 = shalt.err (!%p1890_p10)
}
  0xc5   :  { %s1894_s30 = scalar_lea.vmem %s112_s9, 128  ;;  %p1899_p12 = scmp.lt.s32.totalorder %s112_s9, %s112_s9 }
  0xc6   :  { %p1895_p11 = scmp.ne.s32.totalorder %s112_s9, %s1894_s30  ;;  %p1900_p13 = scmp.lt.s32.totalorder %s1894_s30, %s1894_s30 }
  0xc8   :  { %p1901_p0 = por %p1900_p13, %p1899_p12 }
  0xca   :  { %p1902_p1 = pnand %p1901_p0, %p1895_p11 }
  0xcc   :  { %1905 = shalt.err (!%p1902_p1)
}
  0xcd   :  { %114 = dma.hbm_to_vmem [thread:$0]  %s2523_s5, 128, %s112_s9, [#allocation13]  }
  0xce   :  { %s2021_s12 = smov [#allocation17]   ;;  %s2022_s3 = smov [#allocation20]  }
  0xcf   :  { %s133_s4 = sshll.u32 %s2021_s12, 4  ;;  %s155_s28 = sshll.u32 %s2022_s3, 4  ;;  %s134_s4 = int_to_ptr.vmem [resolvable:$true] %s133_s4  ;;  %s156_s28 = int_to_ptr.vmem [resolvable:$true] %s155_s28 }
  0xd0   :  { %s1906_s29 = scalar_lea.hbm %s2485_s10, 16 }
  0xd1   :  { %p1907_p2 = scmp.ne.s32.totalorder %s2485_s10, %s1906_s29  ;;  %p1910_p3 = scmp.lt.u32.totalorder %s1906_s29, %s2485_s10 }
  0xd3   :  { %p1912_p4 = pnand %p1910_p3, %p1907_p2 }
  0xd5   :  { %1915 = shalt.err (!%p1912_p4)
}
  0xd6   :  { %s1916_s9 = scalar_lea.vmem %s134_s4, 16  ;;  %s1920_s5 = scalar_lea.vmem %s134_s4, 32 }
  0xd7   :  { %p1917_p5 = scmp.ne.s32.totalorder %s134_s4, %s1916_s9  ;;  %p1921_p6 = scmp.lt.s32.totalorder %s134_s4, %s134_s4 }
  0xd8   :  { %p1922_p7 = scmp.lt.s32.totalorder %s1920_s5, %s1916_s9 }
  0xda   :  { %p1923_p8 = por %p1922_p7, %p1921_p6 }
  0xdc   :  { %p1924_p9 = pnand %p1923_p8, %p1917_p5 }
  0xde   :  { %1927 = shalt.err (!%p1924_p9)
}
  0xdf   :  { %136 = dma.hbm_to_vmem [thread:$0]  %s2485_s10, 16, %s134_s4, [#allocation16]  }
  0xe0   :  { %s1928_s2 = scalar_lea.hbm %s2488_s13, 128 }
  0xe1   :  { %p1929_p10 = scmp.ne.s32.totalorder %s2488_s13, %s1928_s2  ;;  %p1932_p11 = scmp.lt.u32.totalorder %s1928_s2, %s2488_s13 }
  0xe3   :  { %p1934_p12 = pnand %p1932_p11, %p1929_p10 }
  0xe5   :  { %1937 = shalt.err (!%p1934_p12)
}
  0xe6   :  { %s1938_s29 = scalar_lea.vmem %s156_s28, 128  ;;  %p1943_p0 = scmp.lt.s32.totalorder %s156_s28, %s156_s28 }
  0xe7   :  { %p1939_p13 = scmp.ne.s32.totalorder %s156_s28, %s1938_s29  ;;  %p1944_p1 = scmp.lt.s32.totalorder %s1938_s29, %s1938_s29 }
  0xe9   :  { %p1945_p2 = por %p1944_p1, %p1943_p0 }
  0xeb   :  { %p1946_p3 = pnand %p1945_p2, %p1939_p13 }
  0xed   :  { %1949 = shalt.err (!%p1946_p3)
}
  0xee   :  { %158 = dma.hbm_to_vmem [thread:$0]  %s2488_s13, 128, %s156_s28, [#allocation19]  }
  0xef   :  { %s2023_s25 = smov [#allocation21]   ;;  %s1950_s9 = scalar_lea.hbm %s2491_s16, 16 }
  0xf0   :  { %s169_s7 = sshll.u32 %s2023_s25, 4  ;;  %p1951_p4 = scmp.ne.s32.totalorder %s2491_s16, %s1950_s9  ;;  %s170_s7 = int_to_ptr.vmem [resolvable:$true] %s169_s7 }
  0xf1   :  { %p1954_p5 = scmp.lt.u32.totalorder %s1950_s9, %s2491_s16 }
  0xf3   :  { %p1956_p6 = pnand %p1954_p5, %p1951_p4 }
  0xf5   :  { %1959 = shalt.err (!%p1956_p6)
}
  0xf6   :  { %s1960_s27 = scalar_lea.vmem %s170_s7, 16  ;;  %s1964_s13 = scalar_lea.vmem %s170_s7, 32 }
  0xf7   :  { %p1961_p7 = scmp.ne.s32.totalorder %s170_s7, %s1960_s27  ;;  %p1965_p8 = scmp.lt.s32.totalorder %s170_s7, %s170_s7 }
  0xf8   :  { %p1966_p9 = scmp.lt.s32.totalorder %s1964_s13, %s1960_s27 }
  0xfa   :  { %p1967_p10 = por %p1966_p9, %p1965_p8 }
  0xfc   :  { %p1968_p11 = pnand %p1967_p10, %p1961_p7 }
  0xfe   :  { %1971 = shalt.err (!%p1968_p11)
}
  0xff   :  { %172 = dma.hbm_to_vmem [thread:$0]  %s2491_s16, 16, %s170_s7, [#allocation22]  }
 0x100   :  { %1994 = dma.done.wait [#allocation4], 32  }
 0x101   :  { %1995 = vsyncadd [#allocation4], 4294967264 }
 0x102   :  { %1996 = dma.done.wait [#allocation7], 96  }
 0x103   :  { %1997 = vsyncadd [#allocation7], 4294967200 }
 0x104   :  { %1998 = dma.done.wait [#allocation10], 400  }
 0x105   :  { %1999 = vsyncadd [#allocation10], 4294966896 }
 0x106   :  { %2000 = dma.done.wait [#allocation13], 144  }
 0x107   :  { %2001 = vsyncadd [#allocation13], 4294967152 }
 0x108   :  { %2002 = dma.done.wait [#allocation16], 400  }
 0x109   :  { %2003 = vsyncadd [#allocation16], 4294966896 }
 0x10a   :  { %2004 = dma.done.wait [#allocation19], 144  }
 0x10b   :  { %2005 = vsyncadd [#allocation19], 4294967152 }
 0x10c   :  { %2006 = dma.done.wait [#allocation22], 16  }
 0x10d   :  { %2007 = vsyncadd [#allocation22], 4294967280  ;;  %v2318_v1 = vld [vmem:[#allocation3] sm:$0x3]  ;;  %s2024_s12 = smov 116   ;;  %s2025_s16 = smov 125  }
 0x10e   :  { %281 = vrot.lane.b32.xlu1 %v2318_v1, %s2024_s12  ;;  %v269_v2 = vrot.slane %v2318_v1, 6  ;;  %v273_v3 = vrot.slane %v2318_v1, 4  ;;  %s2026_s3 = smov 113   ;;  %s2027_s8 = smov 122   ;;  %v277_v4 = vrot.slane %v2318_v1, 2  ;;  %vm319_vm0 = vcmask 1042432  }
 0x10f   :  { %s2028_s6 = smov 110   ;;  %s2029_s29 = smov 119   ;;  %v225_v5 = vld [vmem:[#allocation8] sm:$0x7]  ;;  %vm293_vm1 = vcmask 1041408   ;;  %vm295_vm2 = vcmask 1043456  }
 0x110   :  { %270 = vrot.lane.b32.xlu0 %v269_v2, %s2025_s16  ;;  %s2030_s10 = smov 107   ;;  %1509 = vmatprep.subr.msk.mxu0 %vm319_vm0, %v225_v5  ;;  %vm297_vm3 = vcmask 1045504   ;;  %s2031_s4 = smov 123   ;;  %vm314_vm4 = vcmask 23552   ;;  %v1425_v25 = vld [vmem:[#allocation9] ss:$0 sm:$0xff] }
 0x111   :  { %1510 = vmatpush3.msk.msra.mxu0 %vm319_vm0, %v225_v5  ;;  %s2524_s1 = sld [smem:[#allocation36_spill]]  ;;  %vm416_vm5 = vcmask 195584   ;;  %v231_v40 = vld [vmem:[#allocation11] sm:$0xff]  ;;  %v232_v41 = vld [vmem:[#allocation11 + $0x8] sm:$0xff]  ;;  %v233_v43 = vld [vmem:[#allocation11 + $0x10] sm:$0xff]  ;;  %s2032_s20 = smov 99  }
 0x112   :  { %284 = vrot.lane.b32.xlu1 %v269_v2, %s2026_s3  ;;  %v1615_v42 = vpack.c.bf16 %v232_v41, %v231_v40  ;;  %s2525_s13 = sld [smem:[#allocation37_spill]]  ;;  %v236_v59 = vld [vmem:[#allocation15] sm:$0xff]  ;;  %v237_v60 = vld [vmem:[#allocation15 + $0x8] sm:$0xff]  ;;  %v2033_v62 = vmov 0.0|0.0   ;;  %v235_v63 = vld [vmem:[#allocation14] sm:$0x1f] }
 0x113   :  { %v1620_v61 = vpack.c.bf16 %v237_v60, %v236_v59  ;;  %vm694_vm10 = vcmask 1044480   ;;  %v2034_v0 = vmov 0.0   ;;  %v238_v2 = vld [vmem:[#allocation15 + $0x10] sm:$0xff]  ;;  %vm691_vm11 = vcmask 39936  }
 0x114   :  { %274 = vrot.lane.b32.xlu0 %v273_v3, %s2027_s8  ;;  %1616 = vmatprep.subr.bf16.mxu0 %v1615_v42  ;;  %1378 = vst [vmem:[#allocation23] sm:$0x3] %v2034_v0  ;;  %vm2035_vm12 = vmmov 0   ;;  %vm2036_vm13 = vmmov 1   ;;  %vm1019_vm15 = vcmask 89088  }
 0x115   :  { %vm1633_vm14 = vmpackc.low %vm319_vm0, %vm2036_vm13  ;;  %vm787_vm0 = vcmask 261120  }
 0x116   :  { %287 = vrot.lane.b32.xlu1 %v273_v3, %s2028_s6  ;;  %v1436_v3 = vld [vmem:[#allocation12] ss:$0 sm:$0xff] }
 0x117   :  { %v227_v21 = vld [vmem:[%s2524_s1] sm:$0xff]  ;;  %v228_v22 = vld [vmem:[%s2524_s1 + $0x8] sm:$0xff]  ;;  %v229_v24 = vld [vmem:[%s2524_s1 + $0x10] sm:$0xff] }
 0x118   :  { %278 = vrot.lane.b32.xlu0 %v277_v4, %s2029_s29  ;;  %v1611_v23 = vpack.c.bf16 %v228_v22, %v227_v21  ;;  %v1431_v44 = vld [vmem:[%s2525_s13] ss:$0 sm:$0xff] }
 0x11a   :  { %1612 = vmatprep.subr.bf16.mxu1 %v1611_v23 }
 0x11b   :  { %1614 = vmatpush3.bf16.msra.mxu1 %v1611_v23 }
 0x11c   :  { %290 = vrot.lane.b32.xlu0 %v277_v4, %s2030_s10  ;;  %1518 = vmatprep.subr.mxu1 %v229_v24 }
 0x11f   :  { %1519 = vmatpush3.msra.mxu1 %v229_v24  ;;  %v248_v24 = vld [vmem:[%s2489_s14 + $0x10] sm:$0xff] }
 0x120   :  { %1619 = vmatprep.subr.bf16.mxu1 %v2033_v62 }
 0x180   :  { %v282_v6 = vpop.permute.xlu1 %281 }
 0x182   :  { %v271_v7 = vpop.permute.xlu0 %270 }
 0x183   :  { %v294_v10 = vsel %vm293_vm1, %v2318_v1, %v271_v7 }
 0x184   :  { %v285_v8 = vpop.permute.xlu1 %284 }
 0x185   :  { %v299_v15 = vsel %vm293_vm1, %v282_v6, %v285_v8 }
 0x186   :  { %v275_v9 = vpop.permute.xlu0 %274 }
 0x187   :  { %v296_v11 = vsel %vm295_vm2, %v294_v10, %v275_v9 }
 0x188   :  { %v288_v13 = vpop.permute.xlu1 %287 }
 0x189   :  { %v300_v16 = vsel %vm295_vm2, %v299_v15, %v288_v13 }
 0x18a   :  { %v279_v12 = vpop.permute.xlu0 %278 }
 0x18b   :  { %v298_v14 = vsel %vm297_vm3, %v296_v11, %v279_v12 }
 0x18c   :  { %310 = vrot.lane.b32.xlu1 %v298_v14, %s2031_s4 }
 0x18e   :  { %v291_v17 = vpop.permute.xlu0 %290 }
 0x18f   :  { %v301_v18 = vsel %vm297_vm3, %v300_v16, %v291_v17 }
 0x190   :  { %312 = vrot.lane.b32.xlu0 %v301_v18, %s2031_s4  ;;  %1017 = vrot.lane.b32.xlu1 %v2318_v1, %s2032_s20  ;;  %v246_v18 = vld [vmem:[%s2489_s14] sm:$0xff] }
 0x1fe   :  { %v311_v19 = vpop.permute.xlu1 %310 }
 0x1ff   :  { %1511 = vmatprep.mubr.msk.f32.mxu0 %vm314_vm4, %v311_v19  ;;  %v247_v19 = vld [vmem:[%s2489_s14 + $0x8] sm:$0xff] }
 0x200   :  { %v1629_v22 = vpack.c.bf16 %v247_v19, %v246_v18 }
 0x202   :  { %v313_v20 = vpop.permute.xlu0 %312 }
 0x203   :  { %1512 = vmatmul.mubr.msk.f32.vlgmr.msra.gmra.mrb[0].mxu0 %vm314_vm4, %v313_v20 }
 0x204   :  { %1618 = vmatpush3.bf16.msra.mxu0 %v1615_v42 }
 0x205   :  { %1527 = vmatprep.subr.mxu0 %v233_v43 }
 0x208   :  { %1528 = vmatpush3.msra.mxu0 %v233_v43 }
 0x209   :  { %1541 = vmatprep.subr.mxu0 %v2034_v0 }
 0x2d6   :  { %v1513_v26 = vpop.f32.mrb[0].mxu0 }
 0x2d7   :  { %v395_v27 = vadd.f32 %v1513_v26, %v1425_v25  ;;  %v389_v28 = vpop.f32.mrb[1].mxu0  ;;  %v249_v26 = vld [vmem:[%s2490_s15] sm:$0xff] }
 0x2d8   :  { %v390_v29 = vadd.f32 %v1425_v25, %v389_v28  ;;  %v245_v25 = vld [vmem:[#allocation20] sm:$0x1f] }
 0x2d9   :  { %v401_v30 = vmin.f32 %v395_v27, 0.0  ;;  %vm399_vm7 = vcmp.gt.f32.partialorder %v395_v27, 0.0 }
 0x2da   :  { %v400_v31 = vmin.f32 %v390_v29, 0.0  ;;  %vm398_vm6 = vcmp.gt.f32.partialorder %v390_v29, 0.0 }
 0x2db   :  { %v404_v32 = vmul.f32 1.442695, %v401_v30 }
 0x2dc   :  { %v402_v33 = vmul.f32 1.442695, %v400_v31 }
 0x2dd   :  { %1688 = vpow2.f32 %v404_v32  ;;  %v240_v32 = vld [vmem:[%s2486_s11] sm:$0xff] }
 0x2de   :  { %1690 = vpow2.f32 %v402_v33  ;;  %v242_v33 = vld [vmem:[%s2486_s11 + $0x10] sm:$0xff] }
 0x2e7   :  { %v1689_v34 = vpop.eup %1688 }
 0x2e8   :  { %v1691_v35 = vpop.eup %1690  ;;  %v1430_v36 = vadd.f32 -1.0, %v1689_v34 }
 0x2e9   :  { %v1429_v37 = vadd.f32 -1.0, %v1691_v35  ;;  %v243_v35 = vld [vmem:[%s2486_s11 + $0x18] sm:$0xff] }
 0x2ea   :  { %v409_v39 = vsel %vm399_vm7, %v395_v27, %v1430_v36  ;;  %v250_v27 = vld [vmem:[%s2490_s15 + $0x8] sm:$0x7]  ;;  %v1626_v36 = vpack.c.bf16 %v243_v35, %v242_v33  ;;  %v1362_v33 = vlaneseq  ;;  %vm1388_vm7 = vcmask 91184  }
 0x2eb   :  { %v408_v38 = vsel %vm398_vm6, %v390_v29, %v1429_v37  ;;  %v1632_v28 = vpack.c.bf16 %v250_v27, %v249_v26  ;;  %v1018_v29 = vpop.permute.xlu1 %1017  ;;  %v1442_v37 = vld [vmem:[#allocation17] ss:$0 sm:$0xff]  ;;  %vm1368_vm6 = vcmask 41984  }
 0x2ec   :  { %1520 = vmatprep.mubr.msk.f32.mxu1 %vm416_vm5, %v408_v38 }
 0x2ed   :  { %1521 = vmatmul.mubr.msk.f32.vlgmr.msra.gmra.mrb[0].mxu1 %vm416_vm5, %v409_v39 }
 0x2ee   :  { %1621 = vmatpush3.bf16.msra.mxu1 %v1620_v61  ;;  %1538 = vmatprep.mubr.msk.f32.mxu1 %vm2035_vm12, %v2034_v0 }
 0x2ef   :  { %1536 = vmatprep.subr.mxu1 %v2034_v0 }
 0x2f2   :  { %1537 = vmatpush3.msra.mxu1 %v238_v2  ;;  %v263_v2 = vld [vmem:[%s2496_s21 + $0x8] sm:$0xff] }
 0x2f3   :  { %1628 = vmatprep.subr.bf16.mxu1 %v2033_v62 }
 0x3c0   :  { %v1522_v45 = vpop.f32.mrb[0].mxu1 }
 0x3c1   :  { %v495_v46 = vadd.f32 %v1522_v45, %v1431_v44  ;;  %v489_v47 = vpop.f32.mrb[1].mxu1  ;;  %v253_v45 = vld [vmem:[%s2492_s17 + $0x8] sm:$0xff] }
 0x3c2   :  { %v490_v48 = vadd.f32 %v1431_v44, %v489_v47  ;;  %v252_v44 = vld [vmem:[%s2492_s17] sm:$0xff]  ;;  %v1450_v47 = vld [vmem:[#allocation21] ss:$0 sm:$0xff] }
 0x3c3   :  { %v501_v49 = vmin.f32 %v495_v46, 0.0  ;;  %vm499_vm9 = vcmp.gt.f32.partialorder %v495_v46, 0.0 }
 0x3c4   :  { %v500_v50 = vmin.f32 %v490_v48, 0.0  ;;  %vm498_vm8 = vcmp.gt.f32.partialorder %v490_v48, 0.0 }
 0x3c5   :  { %v504_v51 = vmul.f32 1.442695, %v501_v49  ;;  %v1636_v49 = vpack.c.bf16 %v253_v45, %v252_v44 }
 0x3c6   :  { %v502_v52 = vmul.f32 1.442695, %v500_v50  ;;  %v254_v50 = vld [vmem:[%s2492_s17 + $0x10] sm:$0xff] }
 0x3c7   :  { %1692 = vpow2.f32 %v504_v51  ;;  %v255_v51 = vld [vmem:[%s2492_s17 + $0x18] sm:$0xff] }
 0x3c8   :  { %1694 = vpow2.f32 %v502_v52 }
 0x3d1   :  { %v1693_v53 = vpop.eup %1692 }
 0x3d2   :  { %v1695_v54 = vpop.eup %1694  ;;  %v1435_v55 = vadd.f32 -1.0, %v1693_v53 }
 0x3d3   :  { %v1434_v56 = vadd.f32 -1.0, %v1695_v54 }
 0x3d4   :  { %v509_v58 = vsel %vm499_vm9, %v495_v46, %v1435_v55  ;;  %vm1400_vm9 = vcmask 107624  }
 0x3d5   :  { %v508_v57 = vsel %vm498_vm8, %v490_v48, %v1434_v56  ;;  %v1639_v56 = vpack.c.bf16 %v255_v51, %v254_v50  ;;  %vm1394_vm8 = vcmask 99424  }
 0x3d6   :  { %1529 = vmatprep.mubr.msk.f32.mxu0 %vm416_vm5, %v508_v57 }
 0x3d7   :  { %1530 = vmatmul.mubr.msk.f32.vlgmr.msra.gmra.mrb[2].mxu0 %vm416_vm5, %v509_v58 }
 0x3d8   :  { %1542 = vmatpush3.msk.msra.mxu0 %vm694_vm10, %v235_v63  ;;  %1543 = vmatprep.mubr.msk.f32.mxu0 %vm2035_vm12, %v2034_v0  ;;  %v262_v63 = vld [vmem:[%s2496_s21] sm:$0xff] }
 0x3d9   :  { %1622 = vmatprep.subr.bf16.mxu0 %v2033_v62 }
 0x3db   :  { %1544 = vmatmul.mubr.msk.f32.vlgmr.msra.gmra.mrb[4].mxu0 %vm691_vm11, %v2318_v1 }
 0x3dc   :  { %1554 = vmatprep.mubr.msk.f32.mxu0 %vm2035_vm12, %v2034_v0 }
 0x4aa   :  { %v1531_v4 = vpop.f32.mrb[2].mxu0 }
 0x4ab   :  { %v588_v5 = vpop.f32.mrb[3].mxu0  ;;  %v594_v10 = vadd.f32 %v1531_v4, %v1436_v3  ;;  %v264_v4 = vld [vmem:[%s2496_s21 + $0x10] sm:$0xff] }
 0x4ac   :  { %v589_v6 = vadd.f32 %v1436_v3, %v588_v5  ;;  %v1648_v3 = vpack.c.bf16 %v263_v2, %v262_v63 }
 0x4ad   :  { %v609_v14 = vrot.slane %v594_v10, 2  ;;  %v612_v16 = vrot.slane %v594_v10, 4  ;;  %v615_v20 = vrot.slane %v594_v10, 6 }
 0x4ae   :  { %v598_v7 = vrot.slane %v589_v6, 2  ;;  %v601_v9 = vrot.slane %v589_v6, 4  ;;  %v604_v12 = vrot.slane %v589_v6, 6  ;;  %v764_v30 = vpop.f32.mrb[4].mxu0 }
 0x4af   :  { %v1545_v31 = vpop.f32.mrb[5].mxu0 }
 0x4b0   :  { %v600_v8 = vmax.f32 %v589_v6, %v598_v7  ;;  %v257_v6 = vld [vmem:[%s2494_s19] sm:$0xff]  ;;  %v258_v7 = vld [vmem:[%s2494_s19 + $0x8] sm:$0xff] }
 0x4b2   :  { %v603_v11 = vmax.f32 %v600_v8, %v601_v9  ;;  %v1642_v8 = vpack.c.bf16 %v258_v7, %v257_v6  ;;  %v259_v9 = vld [vmem:[%s2494_s19 + $0x10] sm:$0xff] }
 0x4b4   :  { %v606_v13 = vmax.f32 %v603_v11, %v604_v12  ;;  %v1444_v12 = vld [vmem:[#allocation18] ss:$0 sm:$0xff] }
 0x4b6   :  { %v607_v15 = vmax.f32 %v606_v13, %v594_v10  ;;  %v260_v10 = vld [vmem:[%s2494_s19 + $0x18] sm:$0xff] }
 0x4b7   :  { %v1645_v11 = vpack.c.bf16 %v260_v10, %v259_v9 }
 0x4b8   :  { %v611_v17 = vmax.f32 %v607_v15, %v609_v14 }
 0x4ba   :  { %v614_v21 = vmax.f32 %v611_v17, %v612_v16 }
 0x4bc   :  { %v617_v23 = vmax.f32 %v614_v21, %v615_v20 }
 0x4be   :  { %1539 = vmatmul.mubr.msk.f32.vlgmr.msra.gmra.mrb[2].mxu1 %vm416_vm5, %v617_v23 }
 0x4bf   :  { %1630 = vmatpush3.bf16.msra.mxu1 %v1629_v22  ;;  %1563 = vmatprep.mubr.msk.f32.mxu1 %vm2035_vm12, %v2034_v0 }
 0x4c0   :  { %1561 = vmatprep.subr.mxu1 %v2034_v0 }
 0x4c3   :  { %1562 = vmatpush3.msra.mxu1 %v248_v24 }
 0x4c4   :  { %1564 = vmatmul.mubr.msk.f32.vlgmr.msra.gmra.mrb[4].mxu1 %vm416_vm5, %v617_v23  ;;  %1566 = vmatprep.subr.mxu1 %v2034_v0  ;;  %vm1348_vm5 = vcmask 40960  }
 0x4c5   :  { %1567 = vmatpush3.msk.msra.mxu1 %vm694_vm10, %v245_v25  ;;  %1568 = vmatprep.mubr.msk.f32.mxu1 %vm2035_vm12, %v2034_v0  ;;  %vm1402_vm10 = vcmask 115824  }
 0x4c6   :  { %1631 = vmatprep.subr.bf16.mxu1 %v2033_v62 }
 0x4cc   :  { %1569 = vmatmul.mubr.msk.f32.vlgmr.msra.gmra.mrb[4].mxu1 %vm691_vm11, %v2318_v1  ;;  %v241_v1 = vld [vmem:[%s2486_s11 + $0x8] sm:$0xff]  ;;  %s2039_s11 = smov [#allocation23]  }
 0x4cd   :  { %1634 = vmatpush3.bf16.msk.msra.mxu1 %vm1633_vm14, %v1632_v28  ;;  %1575 = vmatprep.mubr.msk.f32.mxu1 %vm2035_vm12, %v2034_v0  ;;  %v1623_v34 = vpack.c.bf16 %v241_v1, %v240_v32  ;;  %s1410_s30 = sshll.u32 %s2039_s11, 4  ;;  %s1411_s30 = int_to_ptr.vmem [resolvable:$true] %s1410_s30 }
 0x4ce   :  { %1641 = vmatprep.subr.bf16.mxu1 %v2033_v62  ;;  %s1972_s27 = scalar_lea.vmem %s1411_s30, 32  ;;  %p1977_p13 = scmp.lt.s32.totalorder %s1411_s30, %s1411_s30 }
 0x4cf   :  { %1624 = vmatpush3.bf16.msra.mxu0 %v1623_v34  ;;  %v1363_v34 = vshrl.u32 %v1362_v33, 7  ;;  %p1973_p12 = scmp.ne.s32.totalorder %s1411_s30, %s1972_s27  ;;  %p1978_p0 = scmp.lt.s32.totalorder %s1972_s27, %s1972_s27 }
 0x4d0   :  { %1625 = vmatprep.subr.bf16.mxu0 %v2033_v62 }
 0x4d1   :  { %p1979_p1 = por %p1978_p0, %p1977_p13 }
 0x4d3   :  { %1627 = vmatpush3.bf16.msra.mxu0 %v1626_v36  ;;  %v1364_v36 = vsub.s32 0, %v1363_v34  ;;  %p1980_p2 = pnand %p1979_p1, %p1973_p12 }
 0x4d4   :  { %1576 = vmatmul.mubr.msk.f32.vlgmr.msra.gmra.mrb[4].mxu1 %vm1019_vm15, %v1018_v29  ;;  %1635 = vmatprep.subr.bf16.mxu0 %v2033_v62  ;;  %v267_v29 = vld [vmem:[%s2498_s23] sm:$0x1] }
 0x4d5   :  { %1597 = vmatprep.mubr.msk.f32.mxu1 %vm2035_vm12, %v2034_v0  ;;  %1643 = vmatpush3.bf16.msra.mxu1 %v1642_v8  ;;  %v1347_v31 = vadd.f32 1.4189385, %v267_v29  ;;  %v1345_v1 = vmul.f32 1.442695, %v267_v29 }
 0x4d6   :  { %1644 = vmatprep.subr.bf16.mxu1 %v2033_v62 }
 0x4d7   :  { %v1349_v32 = vsel %vm1348_vm5, %v1347_v31, 0.0 }
 0x4d9   :  { %1646 = vmatpush3.bf16.msra.mxu1 %v1645_v11 }
 0x591   :  { %v687_v38 = vpop.f32.mrb[2].mxu1 }
 0x592   :  { %v765_v39 = vadd.f32 %v764_v30, %v687_v38  ;;  %v1540_v40 = vpop.f32.mrb[3].mxu1  ;;  %v1352_v30 = vsel %vm1348_vm5, %v267_v29, 0.0  ;;  %v1356_v38 = vmul.f32 -2.0, %v267_v29 }
 0x593   :  { %1353 = vadd.xlane.f32.xlu0 %v1352_v30 }
 0x594   :  { %v774_v41 = vadd.f32 %v1442_v37, %v765_v39  ;;  %v1357_v39 = vmul.f32 1.442695, %v1356_v38 }
 0x596   :  { %v776_v42 = vmin.f32 %v774_v41, 0.0  ;;  %vm775_vm1 = vcmp.gt.f32.partialorder %v774_v41, 0.0 }
 0x597   :  { %1350 = vadd.xlane.f32.xlu0 %v1349_v32 }
 0x598   :  { %v777_v43 = vmul.f32 1.442695, %v776_v42 }
 0x59a   :  { %1696 = vpow2.f32 %v777_v43  ;;  %v224_v43 = vld [vmem:[#allocation6] sm:$0x3] }
 0x5a4   :  { %v1697_v46 = vpop.eup %1696 }
 0x5a5   :  { %v1443_v48 = vadd.f32 -1.0, %v1697_v46 }
 0x5a7   :  { %v1091_v52 = vpop.f32.mrb[4].mxu1  ;;  %v780_v53 = vsel %vm775_vm1, %v774_v41, %v1443_v48  ;;  %v1459_v41 = vld [vmem:[%s2497_s22] ss:$0 sm:$0xff]  ;;  %s2038_s22 = smov 12  }
 0x5a8   :  { %v1653_v54 = vadd.f32 %v1450_v47, %v1091_v52  ;;  %v1577_v55 = vpop.f32.mrb[5].mxu1  ;;  %1555 = vmatmul.mubr.msk.f32.vlgmr.msra.gmra.mrb[6].mxu0 %vm787_vm0, %v780_v53 }
 0x5a9   :  { %1637 = vmatpush3.bf16.msra.mxu0 %v1636_v49  ;;  %1586 = vmatprep.mubr.msk.f32.mxu0 %vm2035_vm12, %v2034_v0  ;;  %v1457_v55 = vld [vmem:[#allocation2] ss:$0 sm:$0xff] }
 0x5aa   :  { %v1097_v57 = vmin.f32 %v1653_v54, 0.0  ;;  %1638 = vmatprep.subr.bf16.mxu0 %v2033_v62  ;;  %vm1096_vm2 = vcmp.gt.f32.partialorder %v1653_v54, 0.0 }
 0x5ac   :  { %v1098_v58 = vmul.f32 1.442695, %v1097_v57 }
 0x5ad   :  { %1640 = vmatpush3.bf16.msra.mxu0 %v1639_v56 }
 0x5ae   :  { %1698 = vpow2.f32 %v1098_v58  ;;  %1647 = vmatprep.subr.bf16.mxu0 %v2033_v62 }
 0x5b8   :  { %v1699_v59 = vpop.eup %1698 }
 0x5b9   :  { %v1453_v60 = vadd.f32 -1.0, %v1699_v59 }
 0x5bb   :  { %v1101_v61 = vsel %vm1096_vm2, %v1653_v54, %v1453_v60 }
 0x5bc   :  { %1587 = vmatmul.mubr.msk.f32.vlgmr.msra.gmra.mrb[8].mxu0 %vm787_vm0, %v1101_v61 }
 0x5bd   :  { %1608 = vmatprep.mubr.msk.f32.mxu0 %vm2035_vm12, %v2034_v0  ;;  %1649 = vmatpush3.bf16.msra.mxu0 %v1648_v3  ;;  %v265_v0 = vld [vmem:[%s2496_s21 + $0x18] sm:$0xff] }
 0x5be   :  { %1650 = vmatprep.subr.bf16.mxu0 %v2033_v62  ;;  %v1651_v5 = vpack.c.bf16 %v265_v0, %v264_v4  ;;  %v1454_v62 = vld [vmem:[%s2493_s18] ss:$0 sm:$0xff]  ;;  %s2037_s18 = smov 6  }
 0x5c1   :  { %1652 = vmatpush3.bf16.msra.mxu0 %v1651_v5 }
 0x620   :  { %v1354_v52 = vpop.xlane.xlu0 %1353 }
 0x621   :  { %v1375_v59 = vrot.slane %v1354_v52, %v1364_v36 }
 0x624   :  { %v1351_v56 = vpop.xlane.xlu0 %1350 }
 0x625   :  { %v1399_v63 = vrot.slane %v1351_v56, %v1364_v36 }
 0x67b   :  { %v857_v13 = vpop.f32.mrb[6].mxu0 }
 0x67c   :  { %v858_v14 = vadd.f32 %v1444_v12, %v857_v13  ;;  %v1556_v15 = vpop.f32.mrb[7].mxu0 }
 0x67e   :  { %v862_v16 = vmin.f32 %v858_v14, 0.0  ;;  %vm861_vm3 = vcmp.gt.f32.partialorder %v858_v14, 0.0 }
 0x680   :  { %v863_v17 = vmul.f32 1.442695, %v862_v16 }
 0x682   :  { %1700 = vpow2.f32 %v863_v17 }
 0x68c   :  { %v1701_v18 = vpop.eup %1700 }
 0x68d   :  { %v1446_v19 = vadd.f32 -1.0, %v1701_v18 }
 0x68f   :  { %v866_v20 = vsel %vm861_vm3, %v858_v14, %v1446_v19  ;;  %v1177_v21 = vpop.f32.mrb[8].mxu0 }
 0x690   :  { %v1178_v22 = vadd.f32 %v1454_v62, %v1177_v21  ;;  %v1588_v23 = vpop.f32.mrb[9].mxu0  ;;  %1609 = vmatmul.mubr.msk.f32.vlgmr.msra.gmra.mrb[10].mxu0 %vm787_vm0, %v866_v20 }
 0x692   :  { %v1182_v24 = vmin.f32 %v1178_v22, 0.0  ;;  %vm1181_vm4 = vcmp.gt.f32.partialorder %v1178_v22, 0.0 }
 0x694   :  { %v1183_v25 = vmul.f32 1.442695, %v1182_v24 }
 0x696   :  { %1702 = vpow2.f32 %v1183_v25 }
 0x697   :  { %1704 = vpow2.f32 %v1345_v1 }
 0x698   :  { %1706 = vpow2.f32 %v1357_v39 }
 0x6a0   :  { %v1703_v26 = vpop.eup %1702 }
 0x6a1   :  { %v1456_v27 = vadd.f32 -1.0, %v1703_v26  ;;  %v1705_v35 = vpop.eup %1704 }
 0x6a2   :  { %v1384_v37 = vrot.slane %v1705_v35, %v1364_v36  ;;  %v1707_v40 = vpop.eup %1706 }
 0x6a3   :  { %v1186_v28 = vsel %vm1181_vm4, %v1178_v22, %v1456_v27  ;;  %v1359_v42 = vmul.f32 0.5, %v1707_v40 }
 0x6a4   :  { %1598 = vmatmul.mubr.msk.f32.vlgmr.msra.gmra.mrb[6].mxu1 %vm787_vm0, %v1186_v28  ;;  %1385 = vrot.lane.b32.xlu0 %v1384_v37, %s2037_s18 }
 0x6a5   :  { %v1365_v48 = vrot.slane %v1359_v42, %v1364_v36 }
 0x716   :  { %v1386_v58 = vpop.permute.xlu0 %1385 }
 0x763   :  { %v1341_v44 = vpop.f32.mrb[10].mxu0 }
 0x764   :  { %v1342_v45 = vadd.f32 %v1459_v41, %v1341_v44  ;;  %v1610_v46 = vpop.f32.mrb[11].mxu0 }
 0x766   :  { %v1355_v47 = vsub.f32 %v224_v43, %v1342_v45  ;;  %1379 = vst.msk [vmem:[#allocation23] sm:$0x3] %vm1368_vm6, %v1342_v45 }
 0x767   :  { %1389 = vst.msk [vmem:[#allocation23] sm:$0x3] %vm1388_vm7, %v1386_v58 }
 0x768   :  { %v1360_v49 = vmul.f32 %v1355_v47, %v1355_v47 }
 0x76a   :  { %v1367_v50 = vmul.f32 %v1365_v48, %v1360_v49 }
 0x76c   :  { %v1369_v51 = vsel %vm1368_vm6, %v1367_v50, 0.0 }
 0x76d   :  { %1370 = vadd.xlane.f32.xlu1 %v1369_v51 }
 0x777   :  { %v1262_v53 = vpop.f32.mrb[6].mxu1 }
 0x778   :  { %v1599_v54 = vpop.f32.mrb[7].mxu1  ;;  %v1263_v57 = vadd.f32 %v1457_v55, %v1262_v53 }
 0x77e   :  { %1391 = vrot.lane.b32.xlu1 %v1263_v57, %s2038_s22 }
 0x7fa   :  { %v1371_v60 = vpop.xlane.xlu1 %1370 }
 0x7fb   :  { %v1376_v61 = vadd.f32 %v1375_v59, %v1371_v60 }
 0x7fd   :  { %v1377_v3 = vadd.f32 5.5136313, %v1376_v61 }
 0x7fe   :  { %v1392_v2 = vpop.permute.xlu1 %1391 }
 0x7ff   :  { %1395 = vst.msk [vmem:[#allocation23] sm:$0x3] %vm1394_vm8, %v1392_v2 }
 0x800   :  { %1401 = vst.msk [vmem:[#allocation23] sm:$0x3] %vm1400_vm9, %v1399_v63 }
 0x801   :  { %1403 = vst.msk [vmem:[#allocation23] sm:$0x3] %vm1402_vm10, %v1377_v3 }
 0x802   :  { %1983 = shalt.err (!%p1980_p2)
}
 0x803   :  { %s1984_s2 = scalar_lea.hbm %s2499_s24, 32 }
 0x804   :  { %p1985_p3 = scmp.ne.s32.totalorder %s2499_s24, %s1984_s2  ;;  %p1988_p4 = scmp.lt.u32.totalorder %s1984_s2, %s2499_s24 }
 0x806   :  { %p1990_p5 = pnand %p1988_p4, %p1985_p3 }
 0x808   :  { %1993 = shalt.err (!%p1990_p5)
}
 0x809   :  { %1413 = dma.vmem_to_hbm [thread:$0]  %s1411_s30, 32, %s2499_s24, [#allocation5]  }
 0x80a   :  { %2008 = dma.done.wait [#allocation5], 32  }
 0x80b   :  { %2009 = vsyncadd [#allocation5], 4294967264 }
 0x80c   :  { %1417 = vsyncpa [#allocation4], 1 }
 0x80d   :  { %1418 = vsyncpa [#allocation7], 1 }
 0x80e   :  { %1419 = vsyncpa [#allocation10], 1 }
 0x80f   :  { %1420 = vsyncpa [#allocation13], 1 }
 0x810   :  { %1421 = vsyncpa [#allocation16], 1 }
 0x811   :  { %1422 = vsyncpa [#allocation19], 1 }
 0x812   :  { %1423 = vsyncpa [#allocation22], 1 }
 0x813   :  { %1424 = vsyncpa [#allocation5], 1 }

</bundles_post_ra>
